<compile_context>
chip_gen: v5e
topology: v5e:2x2
jax: 0.10.0
libtpu: 0.0.40
codegen_flags: <defaults>
</compile_context>

<pallas_src>
import functools

import jax
import jax.numpy as jnp
from jax.experimental import pallas as pl
from jax.experimental.pallas import tpu as pltpu

F32 = jnp.float32
BF16 = jnp.bfloat16


def _pick_dst_tile(n_dst):
    # biggest tile (<=256) that divides n_dst and is a multiple of 8; else use the full dim.
    for t in (256, 128, 64, 32, 16, 8):
        if n_dst % t == 0:
            return t
    return n_dst


# ----------------------- fused per-layer RGAT kernel ------------------------

def rgat_layer_kernel(hs_ref, hd_ref, skw_ref, skb_ref, fcw_ref, al_ref, ar_ref,
                      adj_ref, scale_ref, shift_ref, o_ref, acc_ref,
                      *, num_heads, head_dim):
    H, D = num_heads, head_dim
    j = pl.program_id(1)                    # etype (reduction axis, innermost)
    n_etypes = pl.num_programs(1)

    hs = hs_ref[...].astype(BF16)           # (n_src, cin)  resident across the whole grid
    hd = hd_ref[...].astype(BF16)           # (t_dst, cin)  dst tile (dst nodes = src prefix)
    n_src, cin = hs.shape
    t_dst = hd.shape[0]

    # --- skip connection: initialize the accumulator at the first etype ---
    @pl.when(j == 0)
    def _init():
        acc_ref[...] = (
            jnp.dot(hd, skw_ref[...], preferred_element_type=jnp.float32)
            + skb_ref[...])                 # skip bias already includes sum of GATConv biases

    # --- per-etype GATConv, all heads batched ---
    fcw = fcw_ref[...]                      # (H, cin, D)  bf16
    dn_proj = (((2,), (1,)), ((0,), (0,)))  # 'hsc,hcd->hsd'
    fs3 = jax.lax.dot_general(jnp.broadcast_to(hs[None], (H, n_src, cin)), fcw,
                              dn_proj, preferred_element_type=jnp.float32)   # (H, n_src, D)
    fd3 = jax.lax.dot_general(jnp.broadcast_to(hd[None], (H, t_dst, cin)), fcw,
                              dn_proj, preferred_element_type=jnp.float32)   # (H, t_dst, D)

    # attention logits (kept in f32)
    er = jnp.sum(fd3 * ar_ref[...], axis=-1, keepdims=True)                  # (H, t_dst, 1)
    el = jax.lax.dot_general(al_ref[...], fs3, (((2,), (2,)), ((0,), (0,))),
                             preferred_element_type=jnp.float32)             # (H, 1, n_src)

    e = er + el                                                              # (H, t_dst, n_src)
    e = jnp.where(e > 0, e, 0.2 * e)                                         # leaky_relu(0.2)
    mask = adj_ref[...] > 0                                                  # (t_dst, n_src)
    e = jnp.where(mask, e, -1e30)

    # masked softmax over source nodes (per dst node, per head)
    m = jnp.max(e, axis=-1, keepdims=True)
    p = jnp.exp(e - m)
    p = jnp.where(mask, p, 0.0)
    denom = jnp.sum(p, axis=-1, keepdims=True)
    alpha = p * pl.reciprocal(jnp.maximum(denom, 1e-30), approx=True)        # zero-in-deg -> 0

    # aggregation: (H, t_dst, n_src) @ (H, n_src, D) -> (H, t_dst, D)
    out3 = jax.lax.dot_general(alpha.astype(BF16), fs3.astype(BF16),
                               (((2,), (1,)), ((0,), (0,))),
                               preferred_element_type=jnp.float32)
    for h in range(H):   # tiny static unroll; lane-sliced accumulate into VMEM scratch only
        acc_ref[:, pl.ds(h * D, D)] += out3[h]

    # --- epilogue at the last etype: folded eval-BN affine + ELU, single dense HBM store ---
    @pl.when(j == n_etypes - 1)
    def _finish():
        y = acc_ref[...] * scale_ref[...] + shift_ref[...]
        y = jnp.where(y > 0, y, jnp.exp(jnp.minimum(y, 0.0)) - 1.0)          # ELU
        o_ref[...] = y.astype(o_ref.dtype)


def rgat_layer(h, adj, p, num_heads, head_dim):
    """One RGAT layer: skip + sum over etypes of GATConv + BN(eval) + ELU.

    h:   (n_src, cin) f32 node features (dst nodes are the first n_dst rows, DGL MFG convention)
    adj: (n_etypes, n_dst, n_src) bf16 dense edge masks (1 where an edge of that etype exists)
    """
    n_src, cin = h.shape
    n_etypes, n_dst, n_src2 = adj.shape
    assert n_src2 == n_src and n_dst <= n_src
    hid = num_heads * head_dim
    eps = 1e-5

    # fold eval-mode BatchNorm into a per-channel affine (trace-time, tiny)
    inv_std = jax.lax.rsqrt(p["bn_var"] + eps)
    scale = (p["bn_gamma"] * inv_std).reshape(1, hid)
    shift = (p["bn_beta"] - p["bn_mean"] * p["bn_gamma"] * inv_std).reshape(1, hid)
    # fold the per-etype GATConv output biases (added once each) into the skip bias
    skip_b = (p["skip_b"] + jnp.sum(p["conv_bias"], axis=0)).reshape(1, hid)

    skip_w = p["skip_w"].astype(BF16)
    fc_w = p["fc_w"].astype(BF16)           # (E, H, cin, D)

    dst_tile = _pick_dst_tile(n_dst)
    grid = (n_dst // dst_tile, n_etypes)    # etype last = reduction/accumulation axis

    kernel = functools.partial(rgat_layer_kernel, num_heads=num_heads, head_dim=head_dim)
    return pl.pallas_call(
        kernel,
        out_shape=jax.ShapeDtypeStruct((n_dst, hid), F32),
        grid_spec=pltpu.PrefetchScalarGridSpec(
            num_scalar_prefetch=0,
            grid=grid,
            in_specs=[
                pl.BlockSpec((n_src, cin), lambda i, j: (0, 0)),         # all src feats (resident)
                pl.BlockSpec((dst_tile, cin), lambda i, j: (i, 0)),      # dst-tile feats
                pl.BlockSpec((cin, hid), lambda i, j: (0, 0)),           # skip weight
                pl.BlockSpec((1, hid), lambda i, j: (0, 0)),             # skip bias (+conv biases)
                pl.BlockSpec((None, num_heads, cin, head_dim),
                             lambda i, j: (j, 0, 0, 0)),                 # fc weight[etype]
                pl.BlockSpec((None, num_heads, 1, head_dim),
                             lambda i, j: (j, 0, 0, 0)),                 # attn_l[etype]
                pl.BlockSpec((None, num_heads, 1, head_dim),
                             lambda i, j: (j, 0, 0, 0)),                 # attn_r[etype]
                pl.BlockSpec((None, dst_tile, n_src),
                             lambda i, j: (j, i, 0)),                    # adjacency[etype]
                pl.BlockSpec((1, hid), lambda i, j: (0, 0)),             # BN scale
                pl.BlockSpec((1, hid), lambda i, j: (0, 0)),             # BN shift
            ],
            out_specs=pl.BlockSpec((dst_tile, hid), lambda i, j: (i, 0)),
            scratch_shapes=[pltpu.VMEM((dst_tile, hid), F32)],
        ),
        compiler_params=pltpu.CompilerParams(
            dimension_semantics=("parallel", "arbitrary")),
    )(h, h, skip_w, skip_b, fc_w, p["attn_l"], p["attn_r"], adj, scale, shift)


# ------------------------- fused MLP head kernel ----------------------------

def mlp_kernel(x_ref, w1_ref, b1_ref, w2_ref, b2_ref, o_ref):
    # Linear -> (folded eval-BN) -> ReLU -> Linear
    x = x_ref[...].astype(BF16)
    z = jnp.dot(x, w1_ref[...], preferred_element_type=jnp.float32) + b1_ref[...]
    z = jnp.maximum(z, 0.0)
    o_ref[...] = (jnp.dot(z.astype(BF16), w2_ref[...],
                          preferred_element_type=jnp.float32) + b2_ref[...]
                  ).astype(o_ref.dtype)


def mlp_head(h, m):
    n, hid = h.shape
    out_ch = m["w2"].shape[1]
    eps = 1e-5
    s = m["bn_gamma"] * jax.lax.rsqrt(m["bn_var"] + eps)
    t = m["bn_beta"] - m["bn_mean"] * s
    w1 = (m["w1"] * s[None, :]).astype(BF16)          # fold BN (eval) into first Linear
    b1 = (m["b1"] * s + t).reshape(1, hid)
    w2 = m["w2"].astype(BF16)
    b2 = m["b2"].reshape(1, out_ch)
    vmem = pl.BlockSpec(memory_space=pltpu.MemorySpace.VMEM)
    return pl.pallas_call(
        mlp_kernel,
        out_shape=jax.ShapeDtypeStruct((n, out_ch), F32),
        in_specs=[vmem] * 5,
        out_specs=pl.BlockSpec(memory_space=pltpu.MemorySpace.VMEM),
    )(h, w1, b1, w2, b2)


# ------------------------------ parameters ----------------------------------

def init_params(key, in_ch, hid, out_ch, n_etypes, n_layers, n_heads):
    head_dim = hid // n_heads
    keys = iter(jax.random.split(key, 1024))

    def nrm(shape, scale=0.1):
        return scale * jax.random.normal(next(keys), shape, dtype=F32)

    layers = []
    for i in range(n_layers):
        cin = in_ch if i == 0 else hid
        layers.append(dict(
            # GATConv.fc weights for all etypes, head-major: (E, H, cin, D)
            # (equivalent to the torch (cin, H*D) layout, reorganized for head-batched matmul)
            fc_w=nrm((n_etypes, n_heads, cin, head_dim)),
            attn_l=nrm((n_etypes, n_heads, 1, head_dim)),
            attn_r=nrm((n_etypes, n_heads, 1, head_dim)),
            conv_bias=nrm((n_etypes, hid), 0.01),       # GATConv output bias, flattened (H*D,)
            skip_w=nrm((cin, hid)),                     # nn.Linear skip
            skip_b=nrm((hid,), 0.01),
            bn_gamma=jnp.ones((hid,), F32),             # BatchNorm1d (eval / running stats)
            bn_beta=jnp.zeros((hid,), F32),
            bn_mean=jnp.zeros((hid,), F32),
            bn_var=jnp.ones((hid,), F32),
        ))
    mlp = dict(
        w1=nrm((hid, hid)), b1=nrm((hid,), 0.01),
        bn_gamma=jnp.ones((hid,), F32), bn_beta=jnp.zeros((hid,), F32),
        bn_mean=jnp.zeros((hid,), F32), bn_var=jnp.ones((hid,), F32),
        w2=nrm((hid, out_ch)), b2=nrm((out_ch,), 0.01),
    )
    return dict(layers=layers, mlp=mlp)


# -------------------------------- forward -----------------------------------

def rgat_forward(params, x, adjs, *, num_heads, head_dim):
    """adjs: list (len = num_layers) of (num_etypes, n_dst_i, n_src_i) bf16 dense edge masks."""
    h = x
    for layer_p, adj in zip(params["layers"], adjs):
        h = rgat_layer(h, adj, layer_p, num_heads, head_dim)
        # dropout: identity (eval mode)
    return mlp_head(h, params["mlp"])


# ---------------------------------- main -------------------------------------

if __name__ == "__main__":
    in_ch, hid, out_ch = 16, 32, 8
    n_heads, n_etypes, n_layers = 2, 3, 2
    head_dim = hid // n_heads
    # MFG node counts: layer i maps n_nodes[i] src nodes -> n_nodes[i+1] dst nodes,
    # and (DGL MFG convention) dst nodes are the first n_dst of the src set.
    n_nodes = [64, 32, 16]

    key = jax.random.PRNGKey(0)
    kp, kx, ka = jax.random.split(key, 3)
    params = init_params(kp, in_ch, hid, out_ch, n_etypes, n_layers, n_heads)
    x = jax.random.normal(kx, (n_nodes[0], in_ch), dtype=F32)

    adjs = []
    akeys = jax.random.split(ka, n_layers)
    for i in range(n_layers):
        adjs.append(
            jax.random.bernoulli(
                akeys[i], 0.3, (n_etypes, n_nodes[i + 1], n_nodes[i])
            ).astype(BF16)                              # bf16 edge masks: half the HBM bytes
        )

    fwd = jax.jit(functools.partial(rgat_forward, num_heads=n_heads, head_dim=head_dim))
    out = fwd(params, x, adjs)
    out = jax.block_until_ready(out)
    assert out.shape == (n_nodes[-1], out_ch), out.shape
    assert bool(jnp.all(jnp.isfinite(out)))
    print("KERNEL_OK")
</pallas_src>

<mosaic_0001>
module attributes {stable_mosaic.version = 11 : i64} {
  func.func @rgat_layer_kernel(%arg0: i32, %arg1: i32, %arg2: memref<64x16xf32, #tpu.memory_space<vmem>>, %arg3: memref<32x16xf32, #tpu.memory_space<vmem>>, %arg4: memref<16x32xbf16, #tpu.memory_space<vmem>>, %arg5: memref<1x32xf32, #tpu.memory_space<vmem>>, %arg6: memref<1x2x16x16xbf16, #tpu.memory_space<vmem>>, %arg7: memref<1x2x1x16xf32, #tpu.memory_space<vmem>>, %arg8: memref<1x2x1x16xf32, #tpu.memory_space<vmem>>, %arg9: memref<1x32x64xbf16, #tpu.memory_space<vmem>>, %arg10: memref<1x32xf32, #tpu.memory_space<vmem>>, %arg11: memref<1x32xf32, #tpu.memory_space<vmem>>, %arg12: memref<32x32xf32, #tpu.memory_space<vmem>>, %arg13: memref<32x32xf32, #tpu.memory_space<vmem>>) attributes {dimension_semantics = [#tpu.dimension_semantics<parallel>, #tpu.dimension_semantics<arbitrary>], iteration_bounds = array<i64: 1, 3>, scalar_prefetch = 0 : i64, scratch_operands = 1 : i64, tpu.core_type = #tpu.core_type<tc>, window_params = [{pipeline_mode = #tpu.pipeline_mode<synchronous>, transform_indices = @transform_0, window_bounds = array<i64: 64, 16>}, {transform_indices = @transform_1, window_bounds = array<i64: 32, 16>}, {pipeline_mode = #tpu.pipeline_mode<synchronous>, transform_indices = @transform_2, window_bounds = array<i64: 16, 32>}, {pipeline_mode = #tpu.pipeline_mode<synchronous>, transform_indices = @transform_3, window_bounds = array<i64: 1, 32>}, {transform_indices = @transform_4, window_bounds = array<i64: 1, 2, 16, 16>}, {transform_indices = @transform_5, window_bounds = array<i64: 1, 2, 1, 16>}, {transform_indices = @transform_6, window_bounds = array<i64: 1, 2, 1, 16>}, {transform_indices = @transform_7, window_bounds = array<i64: 1, 32, 64>}, {pipeline_mode = #tpu.pipeline_mode<synchronous>, transform_indices = @transform_8, window_bounds = array<i64: 1, 32>}, {pipeline_mode = #tpu.pipeline_mode<synchronous>, transform_indices = @transform_9, window_bounds = array<i64: 1, 32>}, {transform_indices = @transform_10, window_bounds = array<i64: 32, 32>}]} {
    %c0 = arith.constant 0 : index
    %c0_0 = arith.constant 0 : index
    %0 = vector.load %arg2[%c0, %c0_0] : memref<64x16xf32, #tpu.memory_space<vmem>>, vector<64x16xf32>
    %1 = arith.truncf %0 : vector<64x16xf32> to vector<64x16xbf16>
    %c0_1 = arith.constant 0 : index
    %c0_2 = arith.constant 0 : index
    %2 = vector.load %arg3[%c0_1, %c0_2] : memref<32x16xf32, #tpu.memory_space<vmem>>, vector<32x16xf32>
    %3 = arith.truncf %2 : vector<32x16xf32> to vector<32x16xbf16>
    %c0_i32 = arith.constant 0 : i32
    %4 = arith.cmpi eq, %arg1, %c0_i32 : i32
    %5 = arith.extui %4 : i1 to i32
    %c0_i32_3 = arith.constant 0 : i32
    %6 = arith.cmpi ne, %5, %c0_i32_3 : i32
    scf.if %6 {
      %c0_39 = arith.constant 0 : index
      %c0_40 = arith.constant 0 : index
      %74 = vector.load %arg4[%c0_39, %c0_40] : memref<16x32xbf16, #tpu.memory_space<vmem>>, vector<16x32xbf16>
      %cst_41 = arith.constant dense<0.000000e+00> : vector<32x32xf32>
      %75 = tpu.matmul %3, %74, %cst_41 {dimension_numbers = #tpu.dot_dimension_numbers<[1], [0], [0], [1], [0, 0, 1, 1], [], []>} : vector<32x16xbf16>, vector<16x32xbf16>, vector<32x32xf32> -> vector<32x32xf32>
      %c0_42 = arith.constant 0 : index
      %c0_43 = arith.constant 0 : index
      %76 = vector.load %arg5[%c0_42, %c0_43] : memref<1x32xf32, #tpu.memory_space<vmem>>, vector<1x32xf32>
      %77 = vector.broadcast %76 : vector<1x32xf32> to vector<32x32xf32>
      %78 = arith.addf %75, %77 : vector<32x32xf32>
      %c0_44 = arith.constant 0 : index
      %c0_45 = arith.constant 0 : index
      %79 = vector.load %arg13[%c0_44, %c0_45] : memref<32x32xf32, #tpu.memory_space<vmem>>, vector<32x32xf32>
      tpu.vector_store %arg13[%c0_44, %c0_45], %78 {strides = array<i32>} : memref<32x32xf32, #tpu.memory_space<vmem>>, vector<32x32xf32>,
    } else {
    }
    %c0_4 = arith.constant 0 : index
    %c0_5 = arith.constant 0 : index
    %c0_6 = arith.constant 0 : index
    %c0_7 = arith.constant 0 : index
    %7 = vector.load %arg6[%c0_4, %c0_5, %c0_6, %c0_7] : memref<1x2x16x16xbf16, #tpu.memory_space<vmem>>, vector<1x2x16x16xbf16>
    %8 = vector.shape_cast %7 : vector<1x2x16x16xbf16> to vector<2x16x16xbf16>
    %9 = vector.shape_cast %1 : vector<64x16xbf16> to vector<1x64x16xbf16>
    %10 = vector.shape_cast %9 : vector<1x64x16xbf16> to vector<1x64x16xbf16>
    %11 = vector.broadcast %10 : vector<1x64x16xbf16> to vector<2x64x16xbf16>
    %cst = arith.constant dense<0.000000e+00> : vector<2x64x16xf32>
    %12 = tpu.matmul %11, %8, %cst {dimension_numbers = #tpu.dot_dimension_numbers<[2], [1], [1], [2], [0, 0, 0, 1, 1, 2], [0], [0]>} : vector<2x64x16xbf16>, vector<2x16x16xbf16>, vector<2x64x16xf32> -> vector<2x64x16xf32>
    %13 = vector.shape_cast %3 : vector<32x16xbf16> to vector<1x32x16xbf16>
    %14 = vector.shape_cast %13 : vector<1x32x16xbf16> to vector<1x32x16xbf16>
    %15 = vector.broadcast %14 : vector<1x32x16xbf16> to vector<2x32x16xbf16>
    %cst_8 = arith.constant dense<0.000000e+00> : vector<2x32x16xf32>
    %16 = tpu.matmul %15, %8, %cst_8 {dimension_numbers = #tpu.dot_dimension_numbers<[2], [1], [1], [2], [0, 0, 0, 1, 1, 2], [0], [0]>} : vector<2x32x16xbf16>, vector<2x16x16xbf16>, vector<2x32x16xf32> -> vector<2x32x16xf32>
    %c0_9 = arith.constant 0 : index
    %c0_10 = arith.constant 0 : index
    %c0_11 = arith.constant 0 : index
    %c0_12 = arith.constant 0 : index
    %17 = vector.load %arg8[%c0_9, %c0_10, %c0_11, %c0_12] : memref<1x2x1x16xf32, #tpu.memory_space<vmem>>, vector<1x2x1x16xf32>
    %18 = vector.shape_cast %17 : vector<1x2x1x16xf32> to vector<2x1x16xf32>
    %19 = vector.broadcast %18 : vector<2x1x16xf32> to vector<2x32x16xf32>
    %20 = arith.mulf %16, %19 : vector<2x32x16xf32>
    %cst_13 = arith.constant dense<0.000000e+00> : vector<2x32xf32>
    %21 = vector.multi_reduction <add>, %20, %cst_13 [2] : vector<2x32x16xf32> to vector<2x32xf32>
    %22 = vector.shape_cast %21 : vector<2x32xf32> to vector<2x32x1xf32>
    %c0_14 = arith.constant 0 : index
    %c0_15 = arith.constant 0 : index
    %c0_16 = arith.constant 0 : index
    %c0_17 = arith.constant 0 : index
    %23 = vector.load %arg7[%c0_14, %c0_15, %c0_16, %c0_17] : memref<1x2x1x16xf32, #tpu.memory_space<vmem>>, vector<1x2x1x16xf32>
    %24 = vector.shape_cast %23 : vector<1x2x1x16xf32> to vector<2x1x16xf32>
    %cst_18 = arith.constant dense<0.000000e+00> : vector<2x1x64xf32>
    %25 = tpu.matmul %24, %12, %cst_18 {dimension_numbers = #tpu.dot_dimension_numbers<[2], [2], [1], [1], [0, 0, 0, 1, 1, 1], [0], [0]>} : vector<2x1x16xf32>, vector<2x64x16xf32>, vector<2x1x64xf32> -> vector<2x1x64xf32>
    %26 = vector.broadcast %22 : vector<2x32x1xf32> to vector<2x32x64xf32>
    %27 = vector.broadcast %25 : vector<2x1x64xf32> to vector<2x32x64xf32>
    %28 = arith.addf %26, %27 : vector<2x32x64xf32>
    %cst_19 = arith.constant 0.000000e+00 : f32
    %29 = vector.broadcast %cst_19 : f32 to vector<2x32x64xf32>
    %30 = arith.cmpf ogt, %28, %29 : vector<2x32x64xf32>
    %cst_20 = arith.constant 2.000000e-01 : f32
    %31 = vector.broadcast %cst_20 : f32 to vector<2x32x64xf32>
    %32 = arith.mulf %31, %28 : vector<2x32x64xf32>
    %33 = arith.select %30, %28, %32 : vector<2x32x64xi1>, vector<2x32x64xf32>
    %c0_21 = arith.constant 0 : index
    %c0_22 = arith.constant 0 : index
    %c0_23 = arith.constant 0 : index
    %34 = vector.load %arg9[%c0_21, %c0_22, %c0_23] : memref<1x32x64xbf16, #tpu.memory_space<vmem>>, vector<1x32x64xbf16>
    %35 = vector.shape_cast %34 : vector<1x32x64xbf16> to vector<32x64xbf16>
    %cst_24 = arith.constant 0.000000e+00 : bf16
    %36 = vector.broadcast %cst_24 : bf16 to vector<32x64xbf16>
    %37 = arith.cmpf ogt, %35, %36 : vector<32x64xbf16>
    %cst_25 = arith.constant -1.000000e+30 : f32
    %38 = vector.shape_cast %37 : vector<32x64xi1> to vector<1x32x64xi1>
    %39 = vector.broadcast %38 : vector<1x32x64xi1> to vector<2x32x64xi1>
    %40 = vector.broadcast %cst_25 : f32 to vector<2x32x64xf32>
    %41 = arith.select %39, %33, %40 : vector<2x32x64xi1>, vector<2x32x64xf32>
    %cst_26 = arith.constant dense<0xFF800000> : vector<2x32xf32>
    %42 = vector.multi_reduction <maximumf>, %41, %cst_26 [2] : vector<2x32x64xf32> to vector<2x32xf32>
    %43 = vector.shape_cast %42 : vector<2x32xf32> to vector<2x32x1xf32>
    %44 = vector.broadcast %43 : vector<2x32x1xf32> to vector<2x32x64xf32>
    %45 = arith.subf %41, %44 : vector<2x32x64xf32>
    %46 = math.exp %45 : vector<2x32x64xf32>
    %cst_27 = arith.constant 0.000000e+00 : f32
    %47 = vector.shape_cast %37 : vector<32x64xi1> to vector<1x32x64xi1>
    %48 = vector.broadcast %47 : vector<1x32x64xi1> to vector<2x32x64xi1>
    %49 = vector.broadcast %cst_27 : f32 to vector<2x32x64xf32>
    %50 = arith.select %48, %46, %49 : vector<2x32x64xi1>, vector<2x32x64xf32>
    %cst_28 = arith.constant dense<0.000000e+00> : vector<2x32xf32>
    %51 = vector.multi_reduction <add>, %50, %cst_28 [2] : vector<2x32x64xf32> to vector<2x32xf32>
    %52 = vector.shape_cast %51 : vector<2x32xf32> to vector<2x32x1xf32>
    %cst_29 = arith.constant 1.000000e-30 : f32
    %53 = vector.broadcast %cst_29 : f32 to vector<2x32x1xf32>
    %54 = arith.maximumf %52, %53 : vector<2x32x1xf32>
    %55 = tpu.reciprocal %54 {approx = true} : vector<2x32x1xf32> -> vector<2x32x1xf32>
    %56 = vector.broadcast %55 : vector<2x32x1xf32> to vector<2x32x64xf32>
    %57 = arith.mulf %50, %56 : vector<2x32x64xf32>
    %58 = arith.truncf %57 : vector<2x32x64xf32> to vector<2x32x64xbf16>
    %59 = arith.truncf %12 : vector<2x64x16xf32> to vector<2x64x16xbf16>
    %cst_30 = arith.constant dense<0.000000e+00> : vector<2x32x16xf32>
    %60 = tpu.matmul %58, %59, %cst_30 {dimension_numbers = #tpu.dot_dimension_numbers<[2], [1], [1], [2], [0, 0, 0, 1, 1, 2], [0], [0]>} : vector<2x32x64xbf16>, vector<2x64x16xbf16>, vector<2x32x16xf32> -> vector<2x32x16xf32>
    %c0_31 = arith.constant 0 : index
    %c0_32 = arith.constant 0 : index
    %61 = vector.load %arg13[%c0_31, %c0_32] : memref<32x32xf32, #tpu.memory_space<vmem>>, vector<32x16xf32>
    %62 = vector.extract_strided_slice %60 {offsets = [0, 0, 0], sizes = [1, 32, 16], strides = [1, 1, 1]} : vector<2x32x16xf32> to vector<1x32x16xf32>
    %63 = vector.shape_cast %62 : vector<1x32x16xf32> to vector<32x16xf32>
    %64 = arith.addf %61, %63 : vector<32x16xf32>
    %c0_33 = arith.constant 0 : index
    %c0_34 = arith.constant 0 : index
    %65 = vector.load %arg13[%c0_33, %c0_34] : memref<32x32xf32, #tpu.memory_space<vmem>>, vector<32x16xf32>
    tpu.vector_store %arg13[%c0_33, %c0_34], %64 {strides = array<i32>} : memref<32x32xf32, #tpu.memory_space<vmem>>, vector<32x16xf32>,
    %c0_35 = arith.constant 0 : index
    %c16 = arith.constant 16 : index
    %66 = vector.load %arg13[%c0_35, %c16] : memref<32x32xf32, #tpu.memory_space<vmem>>, vector<32x16xf32>
    %67 = vector.extract_strided_slice %60 {offsets = [1, 0, 0], sizes = [1, 32, 16], strides = [1, 1, 1]} : vector<2x32x16xf32> to vector<1x32x16xf32>
    %68 = vector.shape_cast %67 : vector<1x32x16xf32> to vector<32x16xf32>
    %69 = arith.addf %66, %68 : vector<32x16xf32>
    %c0_36 = arith.constant 0 : index
    %c16_37 = arith.constant 16 : index
    %70 = vector.load %arg13[%c0_36, %c16_37] : memref<32x32xf32, #tpu.memory_space<vmem>>, vector<32x16xf32>
    tpu.vector_store %arg13[%c0_36, %c16_37], %69 {strides = array<i32>} : memref<32x32xf32, #tpu.memory_space<vmem>>, vector<32x16xf32>,
    %c2_i32 = arith.constant 2 : i32
    %71 = arith.cmpi eq, %arg1, %c2_i32 : i32
    %72 = arith.extui %71 : i1 to i32
    %c0_i32_38 = arith.constant 0 : i32
    %73 = arith.cmpi ne, %72, %c0_i32_38 : i32
    scf.if %73 {
      %c0_39 = arith.constant 0 : index
      %c0_40 = arith.constant 0 : index
      %74 = vector.load %arg13[%c0_39, %c0_40] : memref<32x32xf32, #tpu.memory_space<vmem>>, vector<32x32xf32>
      %c0_41 = arith.constant 0 : index
      %c0_42 = arith.constant 0 : index
      %75 = vector.load %arg10[%c0_41, %c0_42] : memref<1x32xf32, #tpu.memory_space<vmem>>, vector<1x32xf32>
      %76 = vector.broadcast %75 : vector<1x32xf32> to vector<32x32xf32>
      %77 = arith.mulf %74, %76 : vector<32x32xf32>
      %c0_43 = arith.constant 0 : index
      %c0_44 = arith.constant 0 : index
      %78 = vector.load %arg11[%c0_43, %c0_44] : memref<1x32xf32, #tpu.memory_space<vmem>>, vector<1x32xf32>
      %79 = vector.broadcast %78 : vector<1x32xf32> to vector<32x32xf32>
      %80 = arith.addf %77, %79 : vector<32x32xf32>
      %cst_45 = arith.constant 0.000000e+00 : f32
      %81 = vector.broadcast %cst_45 : f32 to vector<32x32xf32>
      %82 = arith.cmpf ogt, %80, %81 : vector<32x32xf32>
      %cst_46 = arith.constant 0.000000e+00 : f32
      %83 = vector.broadcast %cst_46 : f32 to vector<32x32xf32>
      %84 = arith.minimumf %80, %83 : vector<32x32xf32>
      %85 = math.exp %84 : vector<32x32xf32>
      %cst_47 = arith.constant 1.000000e+00 : f32
      %86 = vector.broadcast %cst_47 : f32 to vector<32x32xf32>
      %87 = arith.subf %85, %86 : vector<32x32xf32>
      %88 = arith.select %82, %80, %87 : vector<32x32xi1>, vector<32x32xf32>
      %c0_48 = arith.constant 0 : index
      %c0_49 = arith.constant 0 : index
      %89 = vector.load %arg12[%c0_48, %c0_49] : memref<32x32xf32, #tpu.memory_space<vmem>>, vector<32x32xf32>
      tpu.vector_store %arg12[%c0_48, %c0_49], %88 {strides = array<i32>} : memref<32x32xf32, #tpu.memory_space<vmem>>, vector<32x32xf32>,
    } else {
    }
    return
  }
  func.func @transform_0(%arg0: i32, %arg1: i32) -> (i32, i32) {
    %c0_i32 = arith.constant 0 : i32
    %c0_i32_0 = arith.constant 0 : i32
    %c0_i32_1 = arith.constant 0 : i32
    return %c0_i32, %c0_i32_0 : i32, i32
  }
  func.func @transform_1(%arg0: i32, %arg1: i32) -> (i32, i32) {
    %c0_i32 = arith.constant 0 : i32
    %c0_i32_0 = arith.constant 0 : i32
    return %arg0, %c0_i32 : i32, i32
  }
  func.func @transform_2(%arg0: i32, %arg1: i32) -> (i32, i32) {
    %c0_i32 = arith.constant 0 : i32
    %c0_i32_0 = arith.constant 0 : i32
    %c0_i32_1 = arith.constant 0 : i32
    return %c0_i32, %c0_i32_0 : i32, i32
  }
  func.func @transform_3(%arg0: i32, %arg1: i32) -> (i32, i32) {
    %c0_i32 = arith.constant 0 : i32
    %c0_i32_0 = arith.constant 0 : i32
    %c0_i32_1 = arith.constant 0 : i32
    return %c0_i32, %c0_i32_0 : i32, i32
  }
  func.func @transform_4(%arg0: i32, %arg1: i32) -> (i32, i32, i32, i32) {
    %c0_i32 = arith.constant 0 : i32
    %c0_i32_0 = arith.constant 0 : i32
    %c0_i32_1 = arith.constant 0 : i32
    %c0_i32_2 = arith.constant 0 : i32
    return %arg1, %c0_i32, %c0_i32_0, %c0_i32_1 : i32, i32, i32, i32
  }
  func.func @transform_5(%arg0: i32, %arg1: i32) -> (i32, i32, i32, i32) {
    %c0_i32 = arith.constant 0 : i32
    %c0_i32_0 = arith.constant 0 : i32
    %c0_i32_1 = arith.constant 0 : i32
    %c0_i32_2 = arith.constant 0 : i32
    return %arg1, %c0_i32, %c0_i32_0, %c0_i32_1 : i32, i32, i32, i32
  }
  func.func @transform_6(%arg0: i32, %arg1: i32) -> (i32, i32, i32, i32) {
    %c0_i32 = arith.constant 0 : i32
    %c0_i32_0 = arith.constant 0 : i32
    %c0_i32_1 = arith.constant 0 : i32
    %c0_i32_2 = arith.constant 0 : i32
    return %arg1, %c0_i32, %c0_i32_0, %c0_i32_1 : i32, i32, i32, i32
  }
  func.func @transform_7(%arg0: i32, %arg1: i32) -> (i32, i32, i32) {
    %c0_i32 = arith.constant 0 : i32
    %c0_i32_0 = arith.constant 0 : i32
    return %arg1, %arg0, %c0_i32 : i32, i32, i32
  }
  func.func @transform_8(%arg0: i32, %arg1: i32) -> (i32, i32) {
    %c0_i32 = arith.constant 0 : i32
    %c0_i32_0 = arith.constant 0 : i32
    %c0_i32_1 = arith.constant 0 : i32
    return %c0_i32, %c0_i32_0 : i32, i32
  }
  func.func @transform_9(%arg0: i32, %arg1: i32) -> (i32, i32) {
    %c0_i32 = arith.constant 0 : i32
    %c0_i32_0 = arith.constant 0 : i32
    %c0_i32_1 = arith.constant 0 : i32
    return %c0_i32, %c0_i32_0 : i32, i32
  }
  func.func @transform_10(%arg0: i32, %arg1: i32) -> (i32, i32) {
    %c0_i32 = arith.constant 0 : i32
    %c0_i32_0 = arith.constant 0 : i32
    return %arg0, %c0_i32 : i32, i32
  }
}

module attributes {stable_mosaic.version = 11 : i64} {
  func.func @mlp_kernel(%arg0: memref<16x32xf32, #tpu.memory_space<vmem>>, %arg1: memref<32x32xbf16, #tpu.memory_space<vmem>>, %arg2: memref<1x32xf32, #tpu.memory_space<vmem>>, %arg3: memref<32x8xbf16, #tpu.memory_space<vmem>>, %arg4: memref<1x8xf32, #tpu.memory_space<vmem>>, %arg5: memref<16x8xf32, #tpu.memory_space<vmem>>) attributes {dimension_semantics = [], scalar_prefetch = 0 : i64, scratch_operands = 0 : i64, tpu.core_type = #tpu.core_type<tc>} {
    %c0 = arith.constant 0 : index
    %c0_0 = arith.constant 0 : index
    %0 = vector.load %arg0[%c0, %c0_0] : memref<16x32xf32, #tpu.memory_space<vmem>>, vector<16x32xf32>
    %1 = arith.truncf %0 : vector<16x32xf32> to vector<16x32xbf16>
    %c0_1 = arith.constant 0 : index
    %c0_2 = arith.constant 0 : index
    %2 = vector.load %arg1[%c0_1, %c0_2] : memref<32x32xbf16, #tpu.memory_space<vmem>>, vector<32x32xbf16>
    %cst = arith.constant dense<0.000000e+00> : vector<16x32xf32>
    %3 = tpu.matmul %1, %2, %cst {dimension_numbers = #tpu.dot_dimension_numbers<[1], [0], [0], [1], [0, 0, 1, 1], [], []>} : vector<16x32xbf16>, vector<32x32xbf16>, vector<16x32xf32> -> vector<16x32xf32>
    %c0_3 = arith.constant 0 : index
    %c0_4 = arith.constant 0 : index
    %4 = vector.load %arg2[%c0_3, %c0_4] : memref<1x32xf32, #tpu.memory_space<vmem>>, vector<1x32xf32>
    %5 = vector.broadcast %4 : vector<1x32xf32> to vector<16x32xf32>
    %6 = arith.addf %3, %5 : vector<16x32xf32>
    %cst_5 = arith.constant 0.000000e+00 : f32
    %7 = vector.broadcast %cst_5 : f32 to vector<16x32xf32>
    %8 = arith.maximumf %6, %7 : vector<16x32xf32>
    %9 = arith.truncf %8 : vector<16x32xf32> to vector<16x32xbf16>
    %c0_6 = arith.constant 0 : index
    %c0_7 = arith.constant 0 : index
    %10 = vector.load %arg3[%c0_6, %c0_7] : memref<32x8xbf16, #tpu.memory_space<vmem>>, vector<32x8xbf16>
    %cst_8 = arith.constant dense<0.000000e+00> : vector<16x8xf32>
    %11 = tpu.matmul %9, %10, %cst_8 {dimension_numbers = #tpu.dot_dimension_numbers<[1], [0], [0], [1], [0, 0, 1, 1], [], []>} : vector<16x32xbf16>, vector<32x8xbf16>, vector<16x8xf32> -> vector<16x8xf32>
    %c0_9 = arith.constant 0 : index
    %c0_10 = arith.constant 0 : index
    %12 = vector.load %arg4[%c0_9, %c0_10] : memref<1x8xf32, #tpu.memory_space<vmem>>, vector<1x8xf32>
    %13 = vector.broadcast %12 : vector<1x8xf32> to vector<16x8xf32>
    %14 = arith.addf %11, %13 : vector<16x8xf32>
    %c0_11 = arith.constant 0 : index
    %c0_12 = arith.constant 0 : index
    %15 = vector.load %arg5[%c0_11, %c0_12] : memref<16x8xf32, #tpu.memory_space<vmem>>, vector<16x8xf32>
    tpu.vector_store %arg5[%c0_11, %c0_12], %14 {strides = array<i32>} : memref<16x8xf32, #tpu.memory_space<vmem>>, vector<16x8xf32>,
    return
  }
}

module attributes {stable_mosaic.version = 11 : i64} {
  func.func @rgat_layer_kernel(%arg0: i32, %arg1: i32, %arg2: memref<32x32xf32, #tpu.memory_space<vmem>>, %arg3: memref<16x32xf32, #tpu.memory_space<vmem>>, %arg4: memref<32x32xbf16, #tpu.memory_space<vmem>>, %arg5: memref<1x32xf32, #tpu.memory_space<vmem>>, %arg6: memref<1x2x32x16xbf16, #tpu.memory_space<vmem>>, %arg7: memref<1x2x1x16xf32, #tpu.memory_space<vmem>>, %arg8: memref<1x2x1x16xf32, #tpu.memory_space<vmem>>, %arg9: memref<1x16x32xbf16, #tpu.memory_space<vmem>>, %arg10: memref<1x32xf32, #tpu.memory_space<vmem>>, %arg11: memref<1x32xf32, #tpu.memory_space<vmem>>, %arg12: memref<16x32xf32, #tpu.memory_space<vmem>>, %arg13: memref<16x32xf32, #tpu.memory_space<vmem>>) attributes {dimension_semantics = [#tpu.dimension_semantics<parallel>, #tpu.dimension_semantics<arbitrary>], iteration_bounds = array<i64: 1, 3>, scalar_prefetch = 0 : i64, scratch_operands = 1 : i64, tpu.core_type = #tpu.core_type<tc>, window_params = [{pipeline_mode = #tpu.pipeline_mode<synchronous>, transform_indices = @transform_0, window_bounds = array<i64: 32, 32>}, {transform_indices = @transform_1, window_bounds = array<i64: 16, 32>}, {pipeline_mode = #tpu.pipeline_mode<synchronous>, transform_indices = @transform_2, window_bounds = array<i64: 32, 32>}, {pipeline_mode = #tpu.pipeline_mode<synchronous>, transform_indices = @transform_3, window_bounds = array<i64: 1, 32>}, {transform_indices = @transform_4, window_bounds = array<i64: 1, 2, 32, 16>}, {transform_indices = @transform_5, window_bounds = array<i64: 1, 2, 1, 16>}, {transform_indices = @transform_6, window_bounds = array<i64: 1, 2, 1, 16>}, {transform_indices = @transform_7, window_bounds = array<i64: 1, 16, 32>}, {pipeline_mode = #tpu.pipeline_mode<synchronous>, transform_indices = @transform_8, window_bounds = array<i64: 1, 32>}, {pipeline_mode = #tpu.pipeline_mode<synchronous>, transform_indices = @transform_9, window_bounds = array<i64: 1, 32>}, {transform_indices = @transform_10, window_bounds = array<i64: 16, 32>}]} {
    %c0 = arith.constant 0 : index
    %c0_0 = arith.constant 0 : index
    %0 = vector.load %arg2[%c0, %c0_0] : memref<32x32xf32, #tpu.memory_space<vmem>>, vector<32x32xf32>
    %1 = arith.truncf %0 : vector<32x32xf32> to vector<32x32xbf16>
    %c0_1 = arith.constant 0 : index
    %c0_2 = arith.constant 0 : index
    %2 = vector.load %arg3[%c0_1, %c0_2] : memref<16x32xf32, #tpu.memory_space<vmem>>, vector<16x32xf32>
    %3 = arith.truncf %2 : vector<16x32xf32> to vector<16x32xbf16>
    %c0_i32 = arith.constant 0 : i32
    %4 = arith.cmpi eq, %arg1, %c0_i32 : i32
    %5 = arith.extui %4 : i1 to i32
    %c0_i32_3 = arith.constant 0 : i32
    %6 = arith.cmpi ne, %5, %c0_i32_3 : i32
    scf.if %6 {
      %c0_39 = arith.constant 0 : index
      %c0_40 = arith.constant 0 : index
      %74 = vector.load %arg4[%c0_39, %c0_40] : memref<32x32xbf16, #tpu.memory_space<vmem>>, vector<32x32xbf16>
      %cst_41 = arith.constant dense<0.000000e+00> : vector<16x32xf32>
      %75 = tpu.matmul %3, %74, %cst_41 {dimension_numbers = #tpu.dot_dimension_numbers<[1], [0], [0], [1], [0, 0, 1, 1], [], []>} : vector<16x32xbf16>, vector<32x32xbf16>, vector<16x32xf32> -> vector<16x32xf32>
      %c0_42 = arith.constant 0 : index
      %c0_43 = arith.constant 0 : index
      %76 = vector.load %arg5[%c0_42, %c0_43] : memref<1x32xf32, #tpu.memory_space<vmem>>, vector<1x32xf32>
      %77 = vector.broadcast %76 : vector<1x32xf32> to vector<16x32xf32>
      %78 = arith.addf %75, %77 : vector<16x32xf32>
      %c0_44 = arith.constant 0 : index
      %c0_45 = arith.constant 0 : index
      %79 = vector.load %arg13[%c0_44, %c0_45] : memref<16x32xf32, #tpu.memory_space<vmem>>, vector<16x32xf32>
      tpu.vector_store %arg13[%c0_44, %c0_45], %78 {strides = array<i32>} : memref<16x32xf32, #tpu.memory_space<vmem>>, vector<16x32xf32>,
    } else {
    }
    %c0_4 = arith.constant 0 : index
    %c0_5 = arith.constant 0 : index
    %c0_6 = arith.constant 0 : index
    %c0_7 = arith.constant 0 : index
    %7 = vector.load %arg6[%c0_4, %c0_5, %c0_6, %c0_7] : memref<1x2x32x16xbf16, #tpu.memory_space<vmem>>, vector<1x2x32x16xbf16>
    %8 = vector.shape_cast %7 : vector<1x2x32x16xbf16> to vector<2x32x16xbf16>
    %9 = vector.shape_cast %1 : vector<32x32xbf16> to vector<1x32x32xbf16>
    %10 = vector.shape_cast %9 : vector<1x32x32xbf16> to vector<1x32x32xbf16>
    %11 = vector.broadcast %10 : vector<1x32x32xbf16> to vector<2x32x32xbf16>
    %cst = arith.constant dense<0.000000e+00> : vector<2x32x16xf32>
    %12 = tpu.matmul %11, %8, %cst {dimension_numbers = #tpu.dot_dimension_numbers<[2], [1], [1], [2], [0, 0, 0, 1, 1, 2], [0], [0]>} : vector<2x32x32xbf16>, vector<2x32x16xbf16>, vector<2x32x16xf32> -> vector<2x32x16xf32>
    %13 = vector.shape_cast %3 : vector<16x32xbf16> to vector<1x16x32xbf16>
    %14 = vector.shape_cast %13 : vector<1x16x32xbf16> to vector<1x16x32xbf16>
    %15 = vector.broadcast %14 : vector<1x16x32xbf16> to vector<2x16x32xbf16>
    %cst_8 = arith.constant dense<0.000000e+00> : vector<2x16x16xf32>
    %16 = tpu.matmul %15, %8, %cst_8 {dimension_numbers = #tpu.dot_dimension_numbers<[2], [1], [1], [2], [0, 0, 0, 1, 1, 2], [0], [0]>} : vector<2x16x32xbf16>, vector<2x32x16xbf16>, vector<2x16x16xf32> -> vector<2x16x16xf32>
    %c0_9 = arith.constant 0 : index
    %c0_10 = arith.constant 0 : index
    %c0_11 = arith.constant 0 : index
    %c0_12 = arith.constant 0 : index
    %17 = vector.load %arg8[%c0_9, %c0_10, %c0_11, %c0_12] : memref<1x2x1x16xf32, #tpu.memory_space<vmem>>, vector<1x2x1x16xf32>
    %18 = vector.shape_cast %17 : vector<1x2x1x16xf32> to vector<2x1x16xf32>
    %19 = vector.broadcast %18 : vector<2x1x16xf32> to vector<2x16x16xf32>
    %20 = arith.mulf %16, %19 : vector<2x16x16xf32>
    %cst_13 = arith.constant dense<0.000000e+00> : vector<2x16xf32>
    %21 = vector.multi_reduction <add>, %20, %cst_13 [2] : vector<2x16x16xf32> to vector<2x16xf32>
    %22 = vector.shape_cast %21 : vector<2x16xf32> to vector<2x16x1xf32>
    %c0_14 = arith.constant 0 : index
    %c0_15 = arith.constant 0 : index
    %c0_16 = arith.constant 0 : index
    %c0_17 = arith.constant 0 : index
    %23 = vector.load %arg7[%c0_14, %c0_15, %c0_16, %c0_17] : memref<1x2x1x16xf32, #tpu.memory_space<vmem>>, vector<1x2x1x16xf32>
    %24 = vector.shape_cast %23 : vector<1x2x1x16xf32> to vector<2x1x16xf32>
    %cst_18 = arith.constant dense<0.000000e+00> : vector<2x1x32xf32>
    %25 = tpu.matmul %24, %12, %cst_18 {dimension_numbers = #tpu.dot_dimension_numbers<[2], [2], [1], [1], [0, 0, 0, 1, 1, 1], [0], [0]>} : vector<2x1x16xf32>, vector<2x32x16xf32>, vector<2x1x32xf32> -> vector<2x1x32xf32>
    %26 = vector.broadcast %22 : vector<2x16x1xf32> to vector<2x16x32xf32>
    %27 = vector.broadcast %25 : vector<2x1x32xf32> to vector<2x16x32xf32>
    %28 = arith.addf %26, %27 : vector<2x16x32xf32>
    %cst_19 = arith.constant 0.000000e+00 : f32
    %29 = vector.broadcast %cst_19 : f32 to vector<2x16x32xf32>
    %30 = arith.cmpf ogt, %28, %29 : vector<2x16x32xf32>
    %cst_20 = arith.constant 2.000000e-01 : f32
    %31 = vector.broadcast %cst_20 : f32 to vector<2x16x32xf32>
    %32 = arith.mulf %31, %28 : vector<2x16x32xf32>
    %33 = arith.select %30, %28, %32 : vector<2x16x32xi1>, vector<2x16x32xf32>
    %c0_21 = arith.constant 0 : index
    %c0_22 = arith.constant 0 : index
    %c0_23 = arith.constant 0 : index
    %34 = vector.load %arg9[%c0_21, %c0_22, %c0_23] : memref<1x16x32xbf16, #tpu.memory_space<vmem>>, vector<1x16x32xbf16>
    %35 = vector.shape_cast %34 : vector<1x16x32xbf16> to vector<16x32xbf16>
    %cst_24 = arith.constant 0.000000e+00 : bf16
    %36 = vector.broadcast %cst_24 : bf16 to vector<16x32xbf16>
    %37 = arith.cmpf ogt, %35, %36 : vector<16x32xbf16>
    %cst_25 = arith.constant -1.000000e+30 : f32
    %38 = vector.shape_cast %37 : vector<16x32xi1> to vector<1x16x32xi1>
    %39 = vector.broadcast %38 : vector<1x16x32xi1> to vector<2x16x32xi1>
    %40 = vector.broadcast %cst_25 : f32 to vector<2x16x32xf32>
    %41 = arith.select %39, %33, %40 : vector<2x16x32xi1>, vector<2x16x32xf32>
    %cst_26 = arith.constant dense<0xFF800000> : vector<2x16xf32>
    %42 = vector.multi_reduction <maximumf>, %41, %cst_26 [2] : vector<2x16x32xf32> to vector<2x16xf32>
    %43 = vector.shape_cast %42 : vector<2x16xf32> to vector<2x16x1xf32>
    %44 = vector.broadcast %43 : vector<2x16x1xf32> to vector<2x16x32xf32>
    %45 = arith.subf %41, %44 : vector<2x16x32xf32>
    %46 = math.exp %45 : vector<2x16x32xf32>
    %cst_27 = arith.constant 0.000000e+00 : f32
    %47 = vector.shape_cast %37 : vector<16x32xi1> to vector<1x16x32xi1>
    %48 = vector.broadcast %47 : vector<1x16x32xi1> to vector<2x16x32xi1>
    %49 = vector.broadcast %cst_27 : f32 to vector<2x16x32xf32>
    %50 = arith.select %48, %46, %49 : vector<2x16x32xi1>, vector<2x16x32xf32>
    %cst_28 = arith.constant dense<0.000000e+00> : vector<2x16xf32>
    %51 = vector.multi_reduction <add>, %50, %cst_28 [2] : vector<2x16x32xf32> to vector<2x16xf32>
    %52 = vector.shape_cast %51 : vector<2x16xf32> to vector<2x16x1xf32>
    %cst_29 = arith.constant 1.000000e-30 : f32
    %53 = vector.broadcast %cst_29 : f32 to vector<2x16x1xf32>
    %54 = arith.maximumf %52, %53 : vector<2x16x1xf32>
    %55 = tpu.reciprocal %54 {approx = true} : vector<2x16x1xf32> -> vector<2x16x1xf32>
    %56 = vector.broadcast %55 : vector<2x16x1xf32> to vector<2x16x32xf32>
    %57 = arith.mulf %50, %56 : vector<2x16x32xf32>
    %58 = arith.truncf %57 : vector<2x16x32xf32> to vector<2x16x32xbf16>
    %59 = arith.truncf %12 : vector<2x32x16xf32> to vector<2x32x16xbf16>
    %cst_30 = arith.constant dense<0.000000e+00> : vector<2x16x16xf32>
    %60 = tpu.matmul %58, %59, %cst_30 {dimension_numbers = #tpu.dot_dimension_numbers<[2], [1], [1], [2], [0, 0, 0, 1, 1, 2], [0], [0]>} : vector<2x16x32xbf16>, vector<2x32x16xbf16>, vector<2x16x16xf32> -> vector<2x16x16xf32>
    %c0_31 = arith.constant 0 : index
    %c0_32 = arith.constant 0 : index
    %61 = vector.load %arg13[%c0_31, %c0_32] : memref<16x32xf32, #tpu.memory_space<vmem>>, vector<16x16xf32>
    %62 = vector.extract_strided_slice %60 {offsets = [0, 0, 0], sizes = [1, 16, 16], strides = [1, 1, 1]} : vector<2x16x16xf32> to vector<1x16x16xf32>
    %63 = vector.shape_cast %62 : vector<1x16x16xf32> to vector<16x16xf32>
    %64 = arith.addf %61, %63 : vector<16x16xf32>
    %c0_33 = arith.constant 0 : index
    %c0_34 = arith.constant 0 : index
    %65 = vector.load %arg13[%c0_33, %c0_34] : memref<16x32xf32, #tpu.memory_space<vmem>>, vector<16x16xf32>
    tpu.vector_store %arg13[%c0_33, %c0_34], %64 {strides = array<i32>} : memref<16x32xf32, #tpu.memory_space<vmem>>, vector<16x16xf32>,
    %c0_35 = arith.constant 0 : index
    %c16 = arith.constant 16 : index
    %66 = vector.load %arg13[%c0_35, %c16] : memref<16x32xf32, #tpu.memory_space<vmem>>, vector<16x16xf32>
    %67 = vector.extract_strided_slice %60 {offsets = [1, 0, 0], sizes = [1, 16, 16], strides = [1, 1, 1]} : vector<2x16x16xf32> to vector<1x16x16xf32>
    %68 = vector.shape_cast %67 : vector<1x16x16xf32> to vector<16x16xf32>
    %69 = arith.addf %66, %68 : vector<16x16xf32>
    %c0_36 = arith.constant 0 : index
    %c16_37 = arith.constant 16 : index
    %70 = vector.load %arg13[%c0_36, %c16_37] : memref<16x32xf32, #tpu.memory_space<vmem>>, vector<16x16xf32>
    tpu.vector_store %arg13[%c0_36, %c16_37], %69 {strides = array<i32>} : memref<16x32xf32, #tpu.memory_space<vmem>>, vector<16x16xf32>,
    %c2_i32 = arith.constant 2 : i32
    %71 = arith.cmpi eq, %arg1, %c2_i32 : i32
    %72 = arith.extui %71 : i1 to i32
    %c0_i32_38 = arith.constant 0 : i32
    %73 = arith.cmpi ne, %72, %c0_i32_38 : i32
    scf.if %73 {
      %c0_39 = arith.constant 0 : index
      %c0_40 = arith.constant 0 : index
      %74 = vector.load %arg13[%c0_39, %c0_40] : memref<16x32xf32, #tpu.memory_space<vmem>>, vector<16x32xf32>
      %c0_41 = arith.constant 0 : index
      %c0_42 = arith.constant 0 : index
      %75 = vector.load %arg10[%c0_41, %c0_42] : memref<1x32xf32, #tpu.memory_space<vmem>>, vector<1x32xf32>
      %76 = vector.broadcast %75 : vector<1x32xf32> to vector<16x32xf32>
      %77 = arith.mulf %74, %76 : vector<16x32xf32>
      %c0_43 = arith.constant 0 : index
      %c0_44 = arith.constant 0 : index
      %78 = vector.load %arg11[%c0_43, %c0_44] : memref<1x32xf32, #tpu.memory_space<vmem>>, vector<1x32xf32>
      %79 = vector.broadcast %78 : vector<1x32xf32> to vector<16x32xf32>
      %80 = arith.addf %77, %79 : vector<16x32xf32>
      %cst_45 = arith.constant 0.000000e+00 : f32
      %81 = vector.broadcast %cst_45 : f32 to vector<16x32xf32>
      %82 = arith.cmpf ogt, %80, %81 : vector<16x32xf32>
      %cst_46 = arith.constant 0.000000e+00 : f32
      %83 = vector.broadcast %cst_46 : f32 to vector<16x32xf32>
      %84 = arith.minimumf %80, %83 : vector<16x32xf32>
      %85 = math.exp %84 : vector<16x32xf32>
      %cst_47 = arith.constant 1.000000e+00 : f32
      %86 = vector.broadcast %cst_47 : f32 to vector<16x32xf32>
      %87 = arith.subf %85, %86 : vector<16x32xf32>
      %88 = arith.select %82, %80, %87 : vector<16x32xi1>, vector<16x32xf32>
      %c0_48 = arith.constant 0 : index
      %c0_49 = arith.constant 0 : index
      %89 = vector.load %arg12[%c0_48, %c0_49] : memref<16x32xf32, #tpu.memory_space<vmem>>, vector<16x32xf32>
      tpu.vector_store %arg12[%c0_48, %c0_49], %88 {strides = array<i32>} : memref<16x32xf32, #tpu.memory_space<vmem>>, vector<16x32xf32>,
    } else {
    }
    return
  }
  func.func @transform_0(%arg0: i32, %arg1: i32) -> (i32, i32) {
    %c0_i32 = arith.constant 0 : i32
    %c0_i32_0 = arith.constant 0 : i32
    %c0_i32_1 = arith.constant 0 : i32
    return %c0_i32, %c0_i32_0 : i32, i32
  }
  func.func @transform_1(%arg0: i32, %arg1: i32) -> (i32, i32) {
    %c0_i32 = arith.constant 0 : i32
    %c0_i32_0 = arith.constant 0 : i32
    return %arg0, %c0_i32 : i32, i32
  }
  func.func @transform_2(%arg0: i32, %arg1: i32) -> (i32, i32) {
    %c0_i32 = arith.constant 0 : i32
    %c0_i32_0 = arith.constant 0 : i32
    %c0_i32_1 = arith.constant 0 : i32
    return %c0_i32, %c0_i32_0 : i32, i32
  }
  func.func @transform_3(%arg0: i32, %arg1: i32) -> (i32, i32) {
    %c0_i32 = arith.constant 0 : i32
    %c0_i32_0 = arith.constant 0 : i32
    %c0_i32_1 = arith.constant 0 : i32
    return %c0_i32, %c0_i32_0 : i32, i32
  }
  func.func @transform_4(%arg0: i32, %arg1: i32) -> (i32, i32, i32, i32) {
    %c0_i32 = arith.constant 0 : i32
    %c0_i32_0 = arith.constant 0 : i32
    %c0_i32_1 = arith.constant 0 : i32
    %c0_i32_2 = arith.constant 0 : i32
    return %arg1, %c0_i32, %c0_i32_0, %c0_i32_1 : i32, i32, i32, i32
  }
  func.func @transform_5(%arg0: i32, %arg1: i32) -> (i32, i32, i32, i32) {
    %c0_i32 = arith.constant 0 : i32
    %c0_i32_0 = arith.constant 0 : i32
    %c0_i32_1 = arith.constant 0 : i32
    %c0_i32_2 = arith.constant 0 : i32
    return %arg1, %c0_i32, %c0_i32_0, %c0_i32_1 : i32, i32, i32, i32
  }
  func.func @transform_6(%arg0: i32, %arg1: i32) -> (i32, i32, i32, i32) {
    %c0_i32 = arith.constant 0 : i32
    %c0_i32_0 = arith.constant 0 : i32
    %c0_i32_1 = arith.constant 0 : i32
    %c0_i32_2 = arith.constant 0 : i32
    return %arg1, %c0_i32, %c0_i32_0, %c0_i32_1 : i32, i32, i32, i32
  }
  func.func @transform_7(%arg0: i32, %arg1: i32) -> (i32, i32, i32) {
    %c0_i32 = arith.constant 0 : i32
    %c0_i32_0 = arith.constant 0 : i32
    return %arg1, %arg0, %c0_i32 : i32, i32, i32
  }
  func.func @transform_8(%arg0: i32, %arg1: i32) -> (i32, i32) {
    %c0_i32 = arith.constant 0 : i32
    %c0_i32_0 = arith.constant 0 : i32
    %c0_i32_1 = arith.constant 0 : i32
    return %c0_i32, %c0_i32_0 : i32, i32
  }
  func.func @transform_9(%arg0: i32, %arg1: i32) -> (i32, i32) {
    %c0_i32 = arith.constant 0 : i32
    %c0_i32_0 = arith.constant 0 : i32
    %c0_i32_1 = arith.constant 0 : i32
    return %c0_i32, %c0_i32_0 : i32, i32
  }
  func.func @transform_10(%arg0: i32, %arg1: i32) -> (i32, i32) {
    %c0_i32 = arith.constant 0 : i32
    %c0_i32_0 = arith.constant 0 : i32
    return %arg0, %c0_i32 : i32, i32
  }
}

</mosaic_0001>

<bundles_post_ra>
// kernel: rgat_forward.5
= control target key start
LH: loop header
LB: loop body
LE: loop exit
PB: predicated region body
PF: predicated region fallthrough
CT: control target
= control target key end

     0   :  { %vm44_vm0 = vcmask 261120   ;;  %vm102_vm1 = vcmask 64512   ;;  %s195_s1 = inlined_call_operand.vmem [shape: bf16[32,32], index: 1, kind: input, shape index: {}]   ;;  %s196_s0 = inlined_call_operand.vmem [shape: f32[16,32], index: 0, kind: input, shape index: {}]   ;;  %s197_s2 = inlined_call_operand.vmem [shape: f32[1,32], index: 2, kind: input, shape index: {}]   ;;  %s198_s4 = inlined_call_operand.vmem [shape: f32[1,8], index: 4, kind: input, shape index: {}]   ;;  %s199_s3 = inlined_call_operand.vmem [shape: bf16[32,8], index: 3, kind: input, shape index: {}]   ;;  %s200_s5 = inlined_call_operand.vmem [shape: f32[16,8], index: 5, kind: output, shape index: {}]  }
   0x1   :  { %v128_v0 = vld [vmem:[%s195_s1 + $0x8] sm:$0xff]  ;;  %v127_v1 = vld [vmem:[%s195_s1] sm:$0xff] }
   0x2   :  { %54 = vmatpush.bf16.msra.mxu0 %v128_v0  ;;  %v21_v2 = vld [vmem:[%s196_s0] sm:$0xff]  ;;  %v22_v3 = vld [vmem:[%s196_s0 + $0x8] sm:$0xff] }
   0x3   :  { %v23_v4 = vpack.c.bf16 %v22_v3, %v21_v2  ;;  %v130_v5 = vld [vmem:[%s199_s3 + $0x8] sm:$0xff]  ;;  %v129_v6 = vld [vmem:[%s199_s3] sm:$0xff] }
   0x4   :  { %94 = vmatpush.bf16.msra.mxu1 %v130_v5  ;;  %v131_v8 = vld [vmem:[%s197_s2] ss:$0 sm:$0xff] }
   0x5   :  { %v132_v15 = vld [vmem:[%s198_s4] ss:$0 sm:$0xff] }
   0x6   :  { %55 = vmatpush.bf16.msra.mxu0 %v127_v1 }
   0x8   :  { %95 = vmatpush.bf16.msra.mxu1 %v129_v6 }
   0x9   :  { %117 = vmatmul.msk.bf16.vlgmr.msra.gmra.mxu0 %vm44_vm0, %v23_v4 }
  0x86   :  { %v57_v7 = vpop.f32.mrf.mxu0 }
  0x87   :  { %v58_v9 = vadd.f32 %v131_v8, %v57_v7 }
  0x89   :  { %v62_v12 = vmax.f32 %v58_v9, 0.0 }
  0x8e   :  { %v59_v10 = vpop.f32.mrf.mxu0 }
  0x8f   :  { %v60_v11 = vadd.f32 %v131_v8, %v59_v10 }
  0x91   :  { %v63_v13 = vmax.f32 %v60_v11, 0.0 }
  0x93   :  { %v64_v14 = vpack.c.bf16 %v63_v13, %v62_v12 }
  0x95   :  { %126 = vmatmul.msk.bf16.vlgmr.msra.gmra.mxu1 %vm44_vm0, %v64_v14 }
 0x112   :  { %v97_v16 = vpop.f32.mrf.mxu1 }
 0x113   :  { %v98_v17 = vadd.f32 %v132_v15, %v97_v16 }
 0x115   :  { %103 = vst.msk [vmem:[%s200_s5] sm:$0xff] %vm102_vm1, %v98_v17 }
 0x11a   :  { %v99_v18 = vpop.f32.mrf.mxu1 }
 0x11b   :  { %v100_v19 = vadd.f32 %v132_v15, %v99_v18 }
 0x11d   :  { %104 = vst.msk [vmem:[%s200_s5 + $0x8] sm:$0xff] %vm102_vm1, %v100_v19 }

// kernel: rgat_forward.4
= control target key start
LH: loop header
LB: loop body
LE: loop exit
PB: predicated region body
PF: predicated region fallthrough
CT: control target
= control target key end

     0   :  { %s1287_s13 = smov 0   ;;  %s1289_s14 = smov 0   ;;  %s1446_s0 = inlined_call_operand.vmem [shape: f32[32,32], index: 0, kind: input, shape index: {}, may-alias: {0,1}]   ;;  %s1447_s1 = inlined_call_operand.vmem [shape: f32[32,32], index: 1, kind: input, shape index: {}, may-alias: {0,1}]   ;;  %s1448_s2 = inlined_call_operand.vmem [shape: bf16[32,32], index: 2, kind: input, shape index: {}]   ;;  %s1449_s3 = inlined_call_operand.vmem [shape: f32[1,32], index: 3, kind: input, shape index: {}]   ;;  %s1450_s4 = inlined_call_operand.vmem [shape: bf16[3,2,32,16], index: 4, kind: input, shape index: {}]   ;;  %s1451_s5 = inlined_call_operand.vmem [shape: f32[3,2,1,16], index: 5, kind: input, shape index: {}]   ;;  %s1452_s6 = inlined_call_operand.vmem [shape: f32[3,2,1,16], index: 6, kind: input, shape index: {}]   ;;  %s1453_s7 = inlined_call_operand.vmem [shape: bf16[3,16,32], index: 7, kind: input, shape index: {}]   ;;  %s1454_s8 = inlined_call_operand.vmem [shape: f32[1,32], index: 8, kind: input, shape index: {}]   ;;  %s1455_s9 = inlined_call_operand.vmem [shape: f32[1,32], index: 9, kind: input, shape index: {}]   ;;  %s1456_s10 = inlined_call_operand.vmem [shape: f32[16,32], index: 10, kind: output, shape index: {}]  }
   0x1   :  { %s1291_s15 = smov 0  }
   0x2 LB: > { %s29_s16 = sadd.s32 1, %s1225_s14  ;;  %p1087_p0 = scmp.ge.s32.totalorder %s1229_s15, 1  ;;  %s1229_s15 = sphi %s1291_s15, %s20_s15   ;;  %s1225_s14 = sphi %s1289_s14, %s1462_s14   ;;  %s1221_s13 = sphi %s1287_s13, %s1461_s13  }
   0x3   : > { %p30_p1 = scmp.ge.s32.totalorder %s29_s16, 3  ;;  %p370_p2 = scmp.lt.s32.totalorder %s1229_s15, 4 }
   0x5   : > { %s1464_s16 = smov (%p30_p1, %s29_s16), 0  ;;  %p371_p3 = pnand %p1087_p0, %p370_p2 }
   0x6   : > { %p436_p4 = scmp.lt.s32.totalorder (!%p371_p3), %s1221_s13, 2  ;;  %p1094_p5 = scmp.ne.s32.totalorder (!%p371_p3), %s1221_s13, 0 }
   0x7   : > { %374 = sbr.rel (%p371_p3) target bundleno = 1032 (0x408), region = 60 }
   0xc   : > { %v466_v0 = vld [vmem:[%s1446_s0] sm:$0xff]  ;;  %v467_v1 = vld [vmem:[%s1446_s0 + $0x8] sm:$0xff]  ;;  %v468_v2 = vld [vmem:[%s1446_s0 + $0x10] sm:$0xff]  ;;  %s437_s29 = scalar_select %p436_p4, %s1221_s13, 2 }
   0xd   : > { %v469_v3 = vld [vmem:[%s1446_s0 + $0x18] sm:$0xff]  ;;  %v470_v4 = vpack.c.bf16 %v466_v0, %v466_v0  ;;  %v471_v5 = vpack.c.bf16 %v467_v1, %v467_v1  ;;  %v472_v6 = vpack.c.bf16 %v468_v2, %v468_v2  ;;  %v474_v7 = vld [vmem:[%s1447_s1] sm:$0xff]  ;;  %v475_v8 = vld [vmem:[%s1447_s1 + $0x8] sm:$0xff]  ;;  %481 = sbr.rel (%p1094_p5) target bundleno = 163 (0xa3), region = 64 }
   0xe   : > { %v473_v9 = vpack.c.bf16 %v469_v3, %v469_v3  ;;  %v476_v10 = vpack.c.bf16 %v474_v7, %v474_v7  ;;  %v477_v11 = vpack.c.bf16 %v475_v8, %v475_v8  ;;  %s1145_s30 = sshll.u32 %s437_s29, 5  ;;  %s1090_s11 = sshll.u32 %s437_s29, 1 }
   0xf   : > { %s1330_s18 = scalar_lea.vmem %s1450_s4, %s1145_s30  ;;  %s1335_s21 = scalar_lea.vmem %s1451_s5, %s1090_s11 }
  0x10   : > { %s1340_s24 = scalar_lea.vmem %s1452_s6, %s1090_s11  ;;  %s1146_s25 = sshll.u32 %s437_s29, 3 }
  0x11   : > { %s1345_s28 = scalar_lea.vmem %s1453_s7, %s1146_s25 }
  0x12   : > { %v1148_v12 = vld [vmem:[%s1448_s2 + $0x8] sm:$0xff]  ;;  %v492_v13 = vunpack.c.l.b16 %v476_v10  ;;  %v493_v14 = vunpack.c.l.b16 %v477_v11  ;;  %v1147_v15 = vld [vmem:[%s1448_s2] sm:$0xff]  ;;  %vm507_vm0 = vcmask 261120  }
  0x13   : > { %517 = vmatpush.bf16.msra.mxu0 %v1148_v12  ;;  %v1182_v17 = vld [vmem:[%s1449_s3] ss:$0 sm:$0xff] }
  0x14   : > { %v494_v16 = vpack.c.b16 %v493_v14, %v492_v13 }
  0x17   : > { %518 = vmatpush.bf16.msra.mxu0 %v1147_v15 }
  0x1a   : > { %1103 = vmatmul.msk.bf16.vlgmr.msra.gmra.mxu0 %vm507_vm0, %v494_v16 }
  0x97   : > { %v520_v18 = vpop.f32.mrf.mxu0 }
  0x98   : > { %v521_v19 = vadd.f32 %v1182_v17, %v520_v18 }
  0x9a   : > { %525 = vst.msk [vmem:[#allocation2] sm:$0xff] %vm507_vm0, %v521_v19 }
  0x9f   : > { %v522_v20 = vpop.f32.mrf.mxu0 }
  0xa0   : > { %v523_v21 = vadd.f32 %v1182_v17, %v522_v20 }
  0xa2   : > { %526 = vst.msk [vmem:[#allocation2 + $0x8] sm:$0xff] %vm507_vm0, %v523_v21 }
  0xa3 PF: > { %v1150_v22 = vld [vmem:[%s1330_s18 + $0x8] sm:$0xff]  ;;  %v1152_v23 = vld [vmem:[%s1330_s18 + $0x18] sm:$0xff]  ;;  %v539_v24 = vunpack.c.l.b16 %v470_v4  ;;  %v540_v25 = vunpack.c.l.b16 %v471_v5  ;;  %v1149_v26 = vld [vmem:[%s1330_s18] sm:$0xff]  ;;  %v616_v28 = vunpack.c.l.b16 %v476_v10  ;;  %v617_v29 = vunpack.c.l.b16 %v477_v11  ;;  %p1138_p6 = scmp.ne.s32.totalorder %s1221_s13, 2 }
  0xa4   : > { %570 = vmatpush.bf16.msra.mxu0 %v1150_v22  ;;  %601 = vmatpush.bf16.msra.mxu1 %v1152_v23  ;;  %v1151_v27 = vld [vmem:[%s1330_s18 + $0x10] sm:$0xff]  ;;  %vm557_vm1 = vcmask 261120   ;;  %v541_v32 = vunpack.c.l.b16 %v472_v6  ;;  %v542_v33 = vunpack.c.l.b16 %v473_v9  ;;  %v1183_v40 = vld [vmem:[%s1340_s24] ss:$0 sm:$0xff]  ;;  %v1184_v42 = vld [vmem:[%s1340_s24 + $0x1] ss:$0 sm:$0xff] }
  0xa5   : > { %628 = vmatpush.bf16.msra.mxu2 %v1150_v22  ;;  %642 = vmatpush.bf16.msra.mxu3 %v1152_v23  ;;  %v543_v30 = vpack.c.b16 %v540_v25, %v539_v24  ;;  %v618_v31 = vpack.c.b16 %v617_v29, %v616_v28  ;;  %vm662_vm2 = vcmask 130048   ;;  %v675_v10 = vld [vmem:[%s1335_s21] sm:$0x1]  ;;  %v676_v11 = vld [vmem:[%s1335_s21 + $0x1] sm:$0x1]  ;;  %s1231_s18 = smov 16  }
  0xa6   : > { %v544_v34 = vpack.c.b16 %v542_v33, %v541_v32  ;;  %v1154_v17 = vld [vmem:[%s1345_s28] sm:$0xff]   ;;  %vm929_vm9 = vcmask 261248  }
  0xa7   : > { %v1156_v24 = vunpack.c.h.bf16 %v1154_v17  ;;  %v1155_v25 = vunpack.c.l.bf16 %v1154_v17 }
  0xa8   : > { %571 = vmatpush.bf16.msra.mxu0 %v1149_v26  ;;  %602 = vmatpush.bf16.msra.mxu1 %v1151_v27 }
  0xa9   : > { %629 = vmatpush.bf16.msra.mxu2 %v1149_v26  ;;  %643 = vmatpush.bf16.msra.mxu3 %v1151_v27  ;;  %vm1386_vm5 = vcmp.gt.f32.partialorder %v1156_v24, 0.0  ;;  %vm1390_vm6 = vcmp.gt.f32.partialorder %v1155_v25, 0.0 }
  0xab   : > { %1112 = vmatmul.msk.bf16.vlgmr.msra.gmra.mxu0 %vm557_vm1, %v543_v30  ;;  %1122 = vmatmul.msk.bf16.vlgmr.msra.gmra.mxu1 %vm557_vm1, %v543_v30 }
  0xac   : > { %1124 = vmatmul.msk.bf16.vlgmr.msra.gmra.mxu2 %vm557_vm1, %v618_v31  ;;  %1125 = vmatmul.msk.bf16.vlgmr.msra.gmra.mxu3 %vm557_vm1, %v618_v31 }
  0xbb   : > { %1113 = vmatmul.msk.bf16.gmra.mxu0 %vm557_vm1, %v544_v34  ;;  %1123 = vmatmul.msk.bf16.gmra.mxu1 %vm557_vm1, %v544_v34 }
 0x128   : > { %v573_v35 = vpop.f32.mrf.mxu0  ;;  %v604_v36 = vpop.f32.mrf.mxu1 }
 0x129   : > { %v835_v60 = vpack.c.bf16 %v573_v35, %v573_v35  ;;  %v839_v3 = vpack.c.bf16 %v604_v36, %v604_v36 }
 0x12b   : > { %v852_v4 = vunpack.c.l.b16 %v835_v60  ;;  %v886_v12 = vunpack.c.l.b16 %v839_v3 }
 0x12f   : > { %v631_v39 = vpop.f32.mrf.mxu2  ;;  %v645_v41 = vpop.f32.mrf.mxu3 }
 0x130   : > { %v575_v37 = vpop.f32.mrf.mxu0  ;;  %v606_v38 = vpop.f32.mrf.mxu1  ;;  %v658_v43 = vmul.f32 %v1183_v40, %v631_v39  ;;  %v660_v44 = vmul.f32 %v1184_v42, %v645_v41 }
 0x131   : > { %v836_v61 = vpack.c.bf16 %v575_v37, %v575_v37  ;;  %v840_v1 = vpack.c.bf16 %v606_v38, %v606_v38 }
 0x132   : > { %v669_v45 = vsel %vm662_vm2, %v660_v44, 0.0  ;;  %v663_v46 = vsel %vm662_vm2, %v658_v43, 0.0 }
 0x133   : > { %670 = vadd.xlane.f32.xlu0 %v669_v45  ;;  %664 = vadd.xlane.f32.xlu1 %v663_v46  ;;  %v853_v5 = vunpack.c.l.b16 %v836_v61  ;;  %v887_v8 = vunpack.c.l.b16 %v840_v1 }
 0x135   : > { %v856_v13 = vpack.c.b16 %v853_v5, %v852_v4  ;;  %v890_v14 = vpack.c.b16 %v887_v8, %v886_v12 }
 0x137   : > { %v633_v49 = vpop.f32.mrf.mxu2  ;;  %v647_v50 = vpop.f32.mrf.mxu3 }
 0x138   : > { %v578_v47 = vpop.f32.mrf.mxu0  ;;  %v609_v48 = vpop.f32.mrf.mxu1  ;;  %v659_v51 = vmul.f32 %v1183_v40, %v633_v49  ;;  %v661_v52 = vmul.f32 %v1184_v42, %v647_v50 }
 0x139   : > { %v837_v57 = vpack.c.bf16 %v578_v47, %v578_v47  ;;  %v841_v63 = vpack.c.bf16 %v609_v48, %v609_v48 }
 0x13a   : > { %v672_v53 = vsel %vm662_vm2, %v661_v52, 0.0  ;;  %v666_v54 = vsel %vm662_vm2, %v659_v51, 0.0 }
 0x13b   : > { %673 = vadd.xlane.f32.xlu0 %v672_v53  ;;  %667 = vadd.xlane.f32.xlu1 %v666_v54  ;;  %v854_v62 = vunpack.c.l.b16 %v837_v57  ;;  %v888_v6 = vunpack.c.l.b16 %v841_v63 }
 0x140   : > { %v580_v55 = vpop.f32.mrf.mxu0  ;;  %v611_v56 = vpop.f32.mrf.mxu1 }
 0x141   : > { %1126 = vmatpush.xpose.msk.msrb.mxu2 %vm662_vm2, %v580_v55  ;;  %1131 = vmatpush.xpose.msk.msrb.mxu3 %vm662_vm2, %v611_v56  ;;  %v838_v58 = vpack.c.bf16 %v580_v55, %v580_v55  ;;  %v842_v59 = vpack.c.bf16 %v611_v56, %v611_v56 }
 0x143   : > { %v855_v0 = vunpack.c.l.b16 %v838_v58  ;;  %v889_v2 = vunpack.c.l.b16 %v842_v59 }
 0x145   : > { %1127 = vmatpush.xpose.msk.msrb.mxu2 %vm662_vm2, %v578_v47  ;;  %1132 = vmatpush.xpose.msk.msrb.mxu3 %vm662_vm2, %v609_v48  ;;  %v857_v7 = vpack.c.b16 %v855_v0, %v854_v62  ;;  %v891_v9 = vpack.c.b16 %v889_v2, %v888_v6 }
 0x149   : > { %1128 = vmatpush.xpose.msk.msrb.mxu2 %vm662_vm2, %v575_v37  ;;  %1133 = vmatpush.xpose.msk.msrb.mxu3 %vm662_vm2, %v606_v38 }
 0x14d   : > { %1129 = vmatpush.xpose.msk.msrb.mxu2 %vm662_vm2, %v573_v35  ;;  %1134 = vmatpush.xpose.msk.msrb.mxu3 %vm662_vm2, %v604_v36 }
 0x150   : > { %1130 = vmatmul.msk.f32.vlgmr.msrb.gmra.mxu2 %vm662_vm2, %v675_v10  ;;  %1135 = vmatmul.msk.f32.vlgmr.msrb.gmra.mxu3 %vm662_vm2, %v676_v11 }
 0x151   : > { %903 = vmatpush.bf16.msra.mxu3 %v891_v9  ;;  %869 = vmatpush.bf16.msra.mxu2 %v857_v7 }
 0x155   : > { %904 = vmatpush.bf16.msra.mxu3 %v890_v14  ;;  %870 = vmatpush.bf16.msra.mxu2 %v856_v13 }
 0x1a6   : > { %v665_v15 = vpop.xlane.xlu1 %664  ;;  %v671_v16 = vpop.xlane.xlu0 %670 }
 0x1ae   : > { %v668_v18 = vpop.xlane.xlu1 %667  ;;  %v674_v23 = vpop.xlane.xlu0 %673 }
 0x1d3   : > { %v709_v19 = vpop.f32.mrf.mxu2  ;;  %v744_v20 = vpop.f32.mrf.mxu3 }
 0x1d4   : > { %v747_v21 = vperm.slane %v709_v19, 0  ;;  %v748_v22 = vperm.slane %v744_v20, 0 }
 0x1d6   : > { %v749_v26 = vadd.f32 %v747_v21, %v665_v15  ;;  %v751_v27 = vadd.f32 %v748_v22, %v671_v16  ;;  %v750_v28 = vadd.f32 %v747_v21, %v668_v18  ;;  %v752_v29 = vadd.f32 %v748_v22, %v674_v23 }
 0x1d8   : > { %v758_v30 = vmul.f32 0.2, %v750_v28  ;;  %vm755_vm3 = vcmp.gt.f32.partialorder %v751_v27, 0.0  ;;  %vm754_vm4 = vcmp.gt.f32.partialorder %v750_v28, 0.0  ;;  %v759_v32 = vmul.f32 0.2, %v751_v27 }
 0x1d9   : > { %vm753_vm7 = vcmp.gt.f32.partialorder %v749_v26, 0.0  ;;  %v757_v34 = vmul.f32 0.2, %v749_v26  ;;  %v760_v36 = vmul.f32 0.2, %v752_v29  ;;  %vm756_vm8 = vcmp.gt.f32.partialorder %v752_v29, 0.0 }
 0x1da   : > { %v762_v35 = vsel %vm754_vm4, %v750_v28, %v758_v30  ;;  %v763_v37 = vsel %vm755_vm3, %v751_v27, %v759_v32 }
 0x1db   : > { %v776_v38 = vsel %vm1386_vm5, %v762_v35, -1e+30  ;;  %v761_v39 = vsel %vm753_vm7, %v749_v26, %v757_v34  ;;  %v777_v40 = vsel %vm1390_vm6, %v763_v37, -1e+30  ;;  %v764_v45 = vsel %vm756_vm8, %v752_v29, %v760_v36  ;;  %v911_v34 = vld [vmem:[#allocation2] sm:$0xff] }
 0x1dc   : > { %v782_v41 = vsel %vm557_vm1, %v776_v38, -inf  ;;  %v775_v42 = vsel %vm1390_vm6, %v761_v39, -1e+30  ;;  %v785_v43 = vsel %vm557_vm1, %v777_v40, -inf  ;;  %v778_v46 = vsel %vm1386_vm5, %v764_v45, -1e+30 }
 0x1dd   : > { %783 = vmax.xlane.f32.xlu1 %v782_v41  ;;  %v779_v44 = vsel %vm557_vm1, %v775_v42, -inf  ;;  %786 = vmax.xlane.f32.xlu2 %v785_v43  ;;  %v788_v47 = vsel %vm557_vm1, %v778_v46, -inf }
 0x1de   : > { %780 = vmax.xlane.f32.xlu0 %v779_v44 }
 0x1e5   : > { %789 = vmax.xlane.f32.xlu2 %v788_v47 }
 0x250   : > { %v784_v48 = vpop.xlane.xlu1 %783  ;;  %v787_v49 = vpop.xlane.xlu2 %786 }
 0x251   : > { %v781_v50 = vpop.xlane.xlu0 %780  ;;  %v793_v51 = vsub.f32 %v777_v40, %v787_v49  ;;  %v792_v52 = vsub.f32 %v776_v38, %v784_v48  ;;  %v912_v38 = vld [vmem:[#allocation2 + $0x8] sm:$0xff] }
 0x252   : > { %v791_v53 = vsub.f32 %v775_v42, %v781_v50 }
 0x253   : > { %v799_v54 = vmul.f32 1.442695, %v793_v51  ;;  %v797_v56 = vmul.f32 1.442695, %v792_v52 }
 0x254   : > { %v795_v55 = vmul.f32 1.442695, %v791_v53 }
 0x255   : > { %1185 = vpow2.f32 %v799_v54 }
 0x256   : > { %1187 = vpow2.f32 %v795_v55 }
 0x257   : > { %1189 = vpow2.f32 %v797_v56 }
 0x258   : > { %v790_v57 = vpop.xlane.xlu2 %789 }
 0x259   : > { %v794_v58 = vsub.f32 %v778_v46, %v790_v57 }
 0x25b   : > { %v1186_v59 = vpop.eup %1185  ;;  %v801_v60 = vmul.f32 1.442695, %v794_v58 }
 0x25c   : > { %v1188_v61 = vpop.eup %1187  ;;  %v805_v62 = vsel %vm1390_vm6, %v1186_v59, 0.0 }
 0x25d   : > { %1191 = vpow2.f32 %v801_v60  ;;  %v813_v63 = vsel %vm557_vm1, %v805_v62, 0.0  ;;  %v803_v0 = vsel %vm1390_vm6, %v1188_v61, 0.0  ;;  %v1190_v2 = vpop.eup %1189 }
 0x25e   : > { %814 = vadd.xlane.f32.xlu2 %v813_v63  ;;  %v807_v1 = vsel %vm557_vm1, %v803_v0, 0.0  ;;  %v804_v3 = vsel %vm1386_vm5, %v1190_v2, 0.0 }
 0x25f   : > { %808 = vadd.xlane.f32.xlu1 %v807_v1  ;;  %v810_v6 = vsel %vm557_vm1, %v804_v3, 0.0 }
 0x263   : > { %v1192_v4 = vpop.eup %1191 }
 0x264   : > { %v806_v5 = vsel %vm1386_vm5, %v1192_v4, 0.0 }
 0x265   : > { %v816_v7 = vsel %vm557_vm1, %v806_v5, 0.0 }
 0x266   : > { %811 = vadd.xlane.f32.xlu2 %v810_v6  ;;  %817 = vadd.xlane.f32.xlu0 %v816_v7 }
 0x2d1   : > { %v815_v8 = vpop.xlane.xlu2 %814 }
 0x2d2   : > { %v809_v9 = vpop.xlane.xlu1 %808  ;;  %v821_v10 = vmax.f32 %v815_v8, 1e-30 }
 0x2d3   : > { %v819_v11 = vmax.f32 %v809_v9, 1e-30 }
 0x2d5   : > { %1193 = vrcp.f32 %v819_v11 }
 0x2d6   : > { %1195 = vrcp.f32 %v821_v10 }
 0x2d9   : > { %v812_v12 = vpop.xlane.xlu2 %811  ;;  %v818_v13 = vpop.xlane.xlu0 %817 }
 0x2da   : > { %v820_v14 = vmax.f32 %v812_v12, 1e-30  ;;  %v822_v15 = vmax.f32 %v818_v13, 1e-30 }
 0x2db   : > { %v1194_v16 = vpop.eup %1193 }
 0x2dc   : > { %1197 = vrcp.f32 %v820_v14  ;;  %v1196_v17 = vpop.eup %1195  ;;  %v827_v18 = vmul.f32 %v1194_v16, %v803_v0 }
 0x2dd   : > { %1199 = vrcp.f32 %v822_v15  ;;  %v829_v19 = vmul.f32 %v1196_v17, %v805_v62 }
 0x2de   : > { %v831_v22 = vpack.c.bf16 %v827_v18, %v827_v18 }
 0x2df   : > { %v833_v24 = vpack.c.bf16 %v829_v19, %v829_v19 }
 0x2e0   : > { %v845_v28 = vunpack.c.l.b16 %v831_v22 }
 0x2e1   : > { %v879_v30 = vunpack.c.l.b16 %v833_v24 }
 0x2e2   : > { %v1198_v20 = vpop.eup %1197 }
 0x2e3   : > { %v1200_v21 = vpop.eup %1199  ;;  %v828_v23 = vmul.f32 %v1198_v20, %v804_v3 }
 0x2e4   : > { %v830_v25 = vmul.f32 %v1200_v21, %v806_v5 }
 0x2e5   : > { %v832_v26 = vpack.c.bf16 %v828_v23, %v828_v23 }
 0x2e6   : > { %v834_v27 = vpack.c.bf16 %v830_v25, %v830_v25 }
 0x2e7   : > { %v846_v29 = vunpack.c.l.b16 %v832_v26 }
 0x2e8   : > { %v880_v31 = vunpack.c.l.b16 %v834_v27 }
 0x2e9   : > { %v847_v32 = vpack.c.b16 %v846_v29, %v845_v28 }
 0x2ea   : > { %v881_v33 = vpack.c.b16 %v880_v31, %v879_v30 }
 0x2eb   : > { %1136 = vmatmul.msk.bf16.vlgmr.msra.gmra.mxu2 %vm557_vm1, %v847_v32 }
 0x2ec   : > { %1137 = vmatmul.msk.bf16.vlgmr.msra.gmra.mxu3 %vm557_vm1, %v881_v33 }
 0x36e   : > { %v872_v35 = vpop.f32.mrf.mxu2 }
 0x36f   : > { %v913_v36 = vadd.f32 %v911_v34, %v872_v35  ;;  %v906_v37 = vpop.f32.mrf.mxu3 }
 0x370   : > { %921 = vrot.lane.b32.xlu0 %v906_v37, %s1231_s18 }
 0x371   : > { %915 = vst.msk [vmem:[#allocation2] sm:$0xff] %vm662_vm2, %v913_v36 }
 0x376   : > { %v874_v39 = vpop.f32.mrf.mxu2 }
 0x377   : > { %v914_v40 = vadd.f32 %v912_v38, %v874_v39  ;;  %v908_v41 = vpop.f32.mrf.mxu3 }
 0x378   : > { %923 = vrot.lane.b32.xlu1 %v908_v41, %s1231_s18  ;;  %v917_v42 = vld [vmem:[#allocation2] sm:$0xff] }
 0x379   : > { %916 = vst.msk [vmem:[#allocation2 + $0x8] sm:$0xff] %vm662_vm2, %v914_v40 }
 0x380   : > { %v918_v45 = vld [vmem:[#allocation2 + $0x8] sm:$0xff] }
 0x3e2   : > { %v922_v43 = vpop.permute.xlu0 %921 }
 0x3e3   : > { %v927_v44 = vadd.f32 %v922_v43, %v917_v42 }
 0x3e5   : > { %930 = vst.msk [vmem:[#allocation2] sm:$0xff] %vm929_vm9, %v927_v44 }
 0x3e9   : > { %935 = sbr.rel (%p1138_p6) target bundleno = 1032 (0x408), region = 68 }
 0x3ea   : > { %v924_v46 = vpop.permute.xlu1 %923 }
 0x3eb   : > { %v928_v47 = vadd.f32 %v924_v46, %v918_v45 }
 0x3ed   : > { %931 = vst.msk [vmem:[#allocation2 + $0x8] sm:$0xff] %vm929_vm9, %v928_v47 }
 0x3ee   : > { %v936_v48 = vld [vmem:[#allocation2] sm:$0xff] }
 0x3ef   : > { %v1201_v49 = vld [vmem:[%s1454_s8] ss:$0 sm:$0xff] }
 0x3f0   : > { %v1202_v50 = vld [vmem:[%s1455_s9] ss:$0 sm:$0xff]  ;;  %v942_v52 = vmul.f32 %v1201_v49, %v936_v48 }
 0x3f2   : > { %v948_v54 = vadd.f32 %v1202_v50, %v942_v52 }
 0x3f4   : > { %v937_v51 = vld [vmem:[#allocation2 + $0x8] sm:$0xff]  ;;  %v952_v56 = vmin.f32 %v948_v54, 0.0  ;;  %vm950_vm10 = vcmp.gt.f32.partialorder %v948_v54, 0.0 }
 0x3f5   : > { %v943_v53 = vmul.f32 %v1201_v49, %v937_v51 }
 0x3f6   : > { %v954_v58 = vmul.f32 1.442695, %v952_v56 }
 0x3f7   : > { %v949_v55 = vadd.f32 %v1202_v50, %v943_v53 }
 0x3f8   : > { %1203 = vpow2.f32 %v954_v58 }
 0x3f9   : > { %v953_v57 = vmin.f32 %v949_v55, 0.0  ;;  %vm951_vm11 = vcmp.gt.f32.partialorder %v949_v55, 0.0 }
 0x3fb   : > { %v956_v59 = vmul.f32 1.442695, %v953_v57 }
 0x3fd   : > { %1205 = vpow2.f32 %v956_v59 }
 0x3fe   : > { %v1204_v60 = vpop.eup %1203 }
 0x3ff   : > { %v1139_v62 = vadd.f32 -1.0, %v1204_v60 }
 0x401   : > { %v960_v0 = vsel %vm950_vm10, %v948_v54, %v1139_v62 }
 0x402   : > { %962 = vst.msk [vmem:[%s1456_s10] sm:$0xff] %vm557_vm1, %v960_v0 }
 0x403   : > { %v1206_v61 = vpop.eup %1205 }
 0x404   : > { %v1140_v63 = vadd.f32 -1.0, %v1206_v61 }
 0x406   : > { %v961_v1 = vsel %vm951_vm11, %v949_v55, %v1140_v63 }
 0x407   : > { %963 = vst.msk [vmem:[%s1456_s10 + $0x8] sm:$0xff] %vm557_vm1, %v961_v1 }
 0x408 PF: > { %s20_s15 = sadd.s32 1, %s1229_s15   ;;  %s1461_s13 = smov %s1225_s14 }
 0x409   : > { %p17_p7 = scmp.ge.s32.totalorder %s20_s15, 5   ;;  %s1462_s14 = smov %s1464_s16 }
 0x40b   :  { %19 = sbr.rel (!%p17_p7) target bundleno = 2 (0x2), region = 110 }

// kernel: rgat_forward.3
= control target key start
LH: loop header
LB: loop body
LE: loop exit
PB: predicated region body
PF: predicated region fallthrough
CT: control target
= control target key end

     0   :  { %s2127_s0 = inlined_call_operand.vmem [shape: f32[64,16], index: 0, kind: input, shape index: {}, may-alias: {0,1}]   ;;  %s2128_s1 = inlined_call_operand.vmem [shape: f32[64,16], index: 1, kind: input, shape index: {}, may-alias: {0,1}]   ;;  %s2129_s2 = inlined_call_operand.vmem [shape: bf16[16,32], index: 2, kind: input, shape index: {}]   ;;  %s2130_s3 = inlined_call_operand.vmem [shape: f32[1,32], index: 3, kind: input, shape index: {}]   ;;  %s2131_s4 = inlined_call_operand.vmem [shape: bf16[3,2,16,16], index: 4, kind: input, shape index: {}]   ;;  %s2132_s5 = inlined_call_operand.vmem [shape: f32[3,2,1,16], index: 5, kind: input, shape index: {}]   ;;  %s2133_s6 = inlined_call_operand.hbm [shape: f32[3,2,1,16], index: 6, kind: input, shape index: {}]   ;;  %s2134_s7 = inlined_call_operand.vmem [shape: bf16[3,32,64], index: 7, kind: input, shape index: {}]   ;;  %s2135_s8 = inlined_call_operand.vmem [shape: f32[1,32], index: 8, kind: input, shape index: {}]   ;;  %s2136_s9 = inlined_call_operand.vmem [shape: f32[1,32], index: 9, kind: input, shape index: {}]   ;;  %s2137_s10 = inlined_call_operand.vmem [shape: f32[32,32], index: 10, kind: output, shape index: {}]  }
   0x1   :  { %2140 = sst [smem:[#allocation8_spill]] %s2133_s6 }
   0x2   :  { %15 = vsyncpa [#allocation4], 0 }
   0x3   :  { %17 = vsyncpa [#allocation4 + $0x1], 0  ;;  %s1730_s13 = smov 0   ;;  %s1732_s14 = smov 0  }
   0x4   :  { %s1734_s15 = smov 0   ;;  %s1736_s16 = smov 0  }
   0x5   :  { %s1738_s17 = smov 0   ;;  %s1740_s18 = smov 0  }
   0x6 LB: > { %2141 = sst [smem:[#allocation6_spill]] %s1666_s17  ;;  %s1401_s19 = sadd.s32 4294967295, %s1670_s18   ;;  %s1670_s18 = sphi %s1740_s18, %s23_s18   ;;  %s1666_s17 = sphi %s1738_s17, %s2157_s17   ;;  %s1662_s16 = sphi %s1736_s16, %s2156_s16   ;;  %s1658_s15 = sphi %s1734_s15, %s2160_s15   ;;  %s1654_s14 = sphi %s1732_s14, %s2159_s14   ;;  %s1650_s13 = sphi %s1730_s13, %s2158_s13  }
   0x7   : > { %s32_s20 = sadd.s32 1, %s1666_s17  ;;  %s183_s21 = sadd.s32 1, %s1658_s15 }
   0x8   : > { %p33_p0 = scmp.ge.s32.totalorder %s32_s20, 3  ;;  %p190_p1 = scmp.ne.s32.totalorder %s1658_s15, %s1654_s14 }
   0x9   : > { %p191_p2 = scmp.eq.s32.totalorder %s1670_s18, 0  ;;  %p196_p4 = scmp.ne.s32.totalorder %s1654_s14, %s1650_s13 }
   0xa   : > { %s2162_s20 = smov (%p33_p0, %s32_s20), 0  ;;  %p197_p5 = scmp.eq.s32.totalorder %s1401_s19, 0 }
   0xb   : > { %2142 = sst [smem:[#allocation7_spill]] %s2162_s20  ;;  %p1766_p3 = por %p191_p2, %p190_p1 }
   0xc   : > { %s180_s23 = ssub.s32 %s1666_s17, %s2162_s20  ;;  %p1773_p7 = por %p197_p5, %p196_p4 }
   0xd   : > { %p181_p6 = scmp.eq.s32.totalorder %s180_s23, 0  ;;  %p1493_p8 = scmp.lt.s32.totalorder %s1670_s18, 3 }
   0xe   : > { %s355_s26 = sand.u32 1, %s1658_s15   ;;  %s1406_s27 = sshll.u32 %s1666_s17, 1 }
   0xf   : > { %s1779_s25 = scalar_select %p181_p6, %s1658_s15, %s183_s21  }
  0x10   : > { %s1405_s28 = sshll.u32 %s355_s26, 1  ;;  %s2145_s6 = sld [smem:[#allocation8_spill]] }
  0x11   : > { %s359_s13 = scalar_lea.vmem [#allocation3], %s1405_s28  ;;  %p1490_p9 = pnand %p1493_p8, %p1766_p3 }
  0x12   : > { %s366_s20 = sshll.u32 %s359_s13, 4  ;;  %p1407_p10 = scmp.ge.s32.totalorder %s1670_s18, 1  ;;  %s367_s20 = int_to_ptr.vmem [resolvable:$true] %s366_s20 }
  0x13   : > { %p387_p11 = scmp.lt.s32.totalorder %s1670_s18, 4  ;;  %s356_s19 = scalar_lea.sflag [#allocation4], %s355_s26 }
  0x14   : > { %s1672_s23 = smov 16   ;;  %s1673_s21 = smov 1  }
  0x15   : > { %p388_p12 = pnand %p1407_p10, %p387_p11 }
  0x16   : > { %s363_s11 = scalar_lea.hbm %s2145_s6, %s1406_s27  ;;  %s393_s17 = sand.u32 (!%p388_p12), 1, %s1654_s14  }
  0x17   : > { %s364_s12 = sshll.u32 %s363_s11, 4  ;;  %391 = sbr.rel (%p388_p12) target bundleno = 1094 (0x446), region = 60  ;;  %s365_s12 = int_to_ptr.hbm [resolvable:$true] %s364_s12 }
  0x18   : > { %1492 = dma.hbm_to_vmem [thread:$0]  (!%p1490_p9), %s365_s12, 32, %s367_s20, %s356_s19, %s1672_s23, %s1672_s23, %s1673_s21  }
  0x19   : > { %s1791_s29 = sshll.u32 (!%p388_p12), %s393_s17, 1  ;;  %s394_s27 = scalar_lea.sflag (!%p388_p12), [#allocation4], %s393_s17 }
  0x1c   : > { %1645 = dma.done.wait (%p1773_p7), %s394_s27, 32  }
  0x1d   : > { %1647 = vsyncadd (%p1773_p7), %s394_s27, 4294967264  ;;  %p464_p13 = scmp.lt.s32.totalorder %s1662_s16, 2  ;;  %v490_v0 = vld [vmem:[%s2127_s0] sm:$0xff]  ;;  %v491_v1 = vld [vmem:[%s2127_s0 + $0x8] sm:$0xff]  ;;  %p1414_p0 = scmp.ne.s32.totalorder %s1662_s16, 0 }
  0x1e   : > { %v1824_v2 = vld [vmem:[%s2127_s0 + $0x10] sm:$0xff]  ;;  %v1829_v3 = vld [vmem:[%s2127_s0 + $0x18] sm:$0xff]  ;;  %v1834_v4 = vld [vmem:[%s2127_s0 + $0x20] sm:$0xff]  ;;  %v498_v6 = vpack.c.bf16 %v490_v0, %v490_v0  ;;  %v499_v7 = vpack.c.bf16 %v491_v1, %v491_v1 }
  0x1f   : > { %s465_s22 = scalar_select %p464_p13, %s1662_s16, 2  ;;  %v1839_v5 = vld [vmem:[%s2127_s0 + $0x28] sm:$0xff]  ;;  %v500_v8 = vpack.c.bf16 %v1824_v2, %v1824_v2  ;;  %v1846_v9 = vld [vmem:[%s2127_s0 + $0x30] sm:$0xff]  ;;  %v1851_v10 = vld [vmem:[%s2127_s0 + $0x38] sm:$0xff]  ;;  %v501_v11 = vpack.c.bf16 %v1829_v3, %v1829_v3  ;;  %v502_v12 = vpack.c.bf16 %v1834_v4, %v1834_v4 }
  0x20   : > { %v503_v13 = vpack.c.bf16 %v1839_v5, %v1839_v5  ;;  %v506_v14 = vld [vmem:[%s2128_s1] sm:$0xff]  ;;  %v504_v15 = vpack.c.bf16 %v1846_v9, %v1846_v9  ;;  %v505_v16 = vpack.c.bf16 %v1851_v10, %v1851_v10  ;;  %v507_v17 = vld [vmem:[%s2128_s1 + $0x8] sm:$0xff]  ;;  %v508_v18 = vld [vmem:[%s2128_s1 + $0x10] sm:$0xff]  ;;  %517 = sbr.rel (%p1414_p0) target bundleno = 179 (0xb3), region = 68 }
  0x21   : > { %s1472_s20 = sshll.u32 %s465_s22, 4  ;;  %s1411_s26 = sshll.u32 %s465_s22, 1  ;;  %v509_v19 = vld [vmem:[%s2128_s1 + $0x18] sm:$0xff]  ;;  %v510_v20 = vpack.c.bf16 %v506_v14, %v506_v14  ;;  %v511_v21 = vpack.c.bf16 %v507_v17, %v507_v17  ;;  %v512_v22 = vpack.c.bf16 %v508_v18, %v508_v18 }
  0x22   : > { %s1803_s12 = scalar_lea.vmem %s2131_s4, %s1472_s20  ;;  %s1808_s17 = scalar_lea.vmem %s2132_s5, %s1411_s26  ;;  %v513_v23 = vpack.c.bf16 %v509_v19, %v509_v19 }
  0x23   : > { %s1813_s24 = scalar_lea.vmem %s2134_s7, %s1472_s20 }
  0x25   : > { %v1474_v24 = vld [vmem:[%s2129_s2] sm:$0xff]  ;;  %v528_v25 = vunpack.c.l.b16 %v510_v20  ;;  %v529_v26 = vunpack.c.l.b16 %v511_v21  ;;  %v530_v27 = vunpack.c.l.b16 %v512_v22  ;;  %v531_v28 = vunpack.c.l.b16 %v513_v23 }
  0x26   : > { %554 = vmatpush.bf16.msra.mxu0 %v1474_v24  ;;  %1486 = vmatpush.bf16.msra.mxu1 %v1474_v24  ;;  %vm540_vm0 = vcmask 130048   ;;  %v1545_v31 = vld [vmem:[%s2130_s3] ss:$0 sm:$0xff]  ;;  %vm566_vm1 = vcmask 261120  }
  0x27   : > { %v532_v29 = vpack.c.b16 %v529_v26, %v528_v25  ;;  %v533_v30 = vpack.c.b16 %v531_v28, %v530_v27 }
  0x29   : > { %1419 = vmatmul.msk.bf16.vlgmr.msra.gmra.mxu0 %vm540_vm0, %v532_v29  ;;  %1420 = vmatmul.msk.bf16.vlgmr.msra.gmra.mxu1 %vm540_vm0, %v533_v30 }
  0xa6   : > { %v556_v32 = vpop.f32.mrf.mxu0  ;;  %v561_v33 = vpop.f32.mrf.mxu1 }
  0xa7   : > { %v557_v34 = vadd.f32 %v1545_v31, %v556_v32  ;;  %v562_v35 = vadd.f32 %v1545_v31, %v561_v33 }
  0xa9   : > { %567 = vst.msk [vmem:[#allocation2] sm:$0xff] %vm566_vm1, %v557_v34 }
  0xaa   : > { %569 = vst.msk [vmem:[#allocation2 + $0x10] sm:$0xff] %vm566_vm1, %v562_v35 }
  0xae   : > { %v558_v36 = vpop.f32.mrf.mxu0  ;;  %v563_v37 = vpop.f32.mrf.mxu1 }
  0xaf   : > { %v559_v38 = vadd.f32 %v1545_v31, %v558_v36  ;;  %v564_v39 = vadd.f32 %v1545_v31, %v563_v37 }
  0xb1   : > { %568 = vst.msk [vmem:[#allocation2 + $0x8] sm:$0xff] %vm566_vm1, %v559_v38 }
  0xb2   : > { %570 = vst.msk [vmem:[#allocation2 + $0x18] sm:$0xff] %vm566_vm1, %v564_v39 }
  0xb3 PF: > { %v1476_v40 = vld [vmem:[%s1803_s12 + $0x8] sm:$0xff]  ;;  %v583_v41 = vunpack.c.l.b16 %v498_v6  ;;  %v584_v42 = vunpack.c.l.b16 %v499_v7  ;;  %v1475_v43 = vld [vmem:[%s1803_s12] sm:$0xff]  ;;  %vm601_vm2 = vcmask 130048   ;;  %v585_v45 = vunpack.c.l.b16 %v500_v8  ;;  %s2146_s12 = scalar_lea.vmem [#allocation3], %s1791_s29  ;;  %s1674_s29 = smov 16  }
  0xb4   : > { %656 = vmatpush.bf16.msra.mxu1 %v1476_v40  ;;  %621 = vmatpush.bf16.msra.mxu0 %v1475_v43  ;;  %v586_v46 = vunpack.c.l.b16 %v501_v11  ;;  %v682_v48 = vunpack.c.l.b16 %v510_v20  ;;  %v683_v49 = vunpack.c.l.b16 %v511_v21  ;;  %v587_v51 = vunpack.c.l.b16 %v502_v12  ;;  %v1929_v9 = vld [vmem:[%s2146_s12 + $0x1] ss:$0 sm:$0xff]  ;;  %s2147_s30 = smov %s2146_s12  ;;  %p1463_p1 = scmp.ne.s32.totalorder %s1662_s16, 2 }
  0xb5   : > { %v591_v44 = vpack.c.b16 %v584_v42, %v583_v41  ;;  %720 = vmatpush.bf16.msra.mxu3 %v1476_v40  ;;  %701 = vmatpush.bf16.msra.mxu2 %v1475_v43  ;;  %v588_v52 = vunpack.c.l.b16 %v503_v13  ;;  %v684_v54 = vunpack.c.l.b16 %v512_v22  ;;  %v685_v55 = vunpack.c.l.b16 %v513_v23  ;;  %v1935_v17 = vld [vmem:[%s2147_s30] ss:$0 sm:$0xff] }
  0xb6   : > { %v592_v47 = vpack.c.b16 %v586_v46, %v585_v45  ;;  %v686_v50 = vpack.c.b16 %v683_v49, %v682_v48  ;;  %v589_v57 = vunpack.c.l.b16 %v504_v15  ;;  %v590_v58 = vunpack.c.l.b16 %v505_v16 }
  0xb7   : > { %1433 = vmatmul.msk.bf16.vlgmr.msra.gmra.mxu1 %vm601_vm2, %v591_v44  ;;  %1425 = vmatmul.msk.bf16.vlgmr.msra.gmra.mxu0 %vm601_vm2, %v591_v44  ;;  %v593_v53 = vpack.c.b16 %v588_v52, %v587_v51  ;;  %v687_v56 = vpack.c.b16 %v685_v55, %v684_v54  ;;  %vm930_vm4 = vcmask 523264   ;;  %vm1213_vm0 = vcmask 261248  }
  0xb8   : > { %1439 = vmatmul.msk.bf16.vlgmr.msra.gmra.mxu3 %vm601_vm2, %v686_v50  ;;  %1437 = vmatmul.msk.bf16.vlgmr.msra.gmra.mxu2 %vm601_vm2, %v686_v50  ;;  %v594_v59 = vpack.c.b16 %v590_v58, %v589_v57 }
  0xc7   : > { %1434 = vmatmul.msk.bf16.gmra.mxu1 %vm601_vm2, %v592_v47  ;;  %1426 = vmatmul.msk.bf16.gmra.mxu0 %vm601_vm2, %v592_v47 }
  0xc8   : > { %1440 = vmatmul.msk.bf16.gmra.mxu3 %vm601_vm2, %v687_v56  ;;  %1438 = vmatmul.msk.bf16.gmra.mxu2 %vm601_vm2, %v687_v56 }
  0xd7   : > { %1435 = vmatmul.msk.bf16.gmra.mxu1 %vm601_vm2, %v593_v53  ;;  %1427 = vmatmul.msk.bf16.gmra.mxu0 %vm601_vm2, %v593_v53 }
  0xe7   : > { %1436 = vmatmul.msk.bf16.gmra.mxu1 %vm601_vm2, %v594_v59  ;;  %1428 = vmatmul.msk.bf16.gmra.mxu0 %vm601_vm2, %v594_v59 }
 0x134   : > { %v1905_v60 = vpop.f32.mrf.mxu1  ;;  %v1907_v61 = vpop.f32.mrf.mxu0 }
 0x135   : > { %v1043_v47 = vpack.c.bf16 %v1907_v61, %v1907_v61 }
 0x13b   : > { %v722_v8 = vpop.f32.mrf.mxu3  ;;  %v703_v16 = vpop.f32.mrf.mxu2 }
 0x13c   : > { %v1909_v62 = vpop.f32.mrf.mxu1  ;;  %v1911_v63 = vpop.f32.mrf.mxu0  ;;  %v744_v10 = vmul.f32 %v1929_v9, %v722_v8  ;;  %v740_v22 = vmul.f32 %v1935_v17, %v703_v16  ;;  %v1051_v8 = vpack.c.bf16 %v1905_v60, %v1905_v60 }
 0x13d   : > { %v1044_v48 = vpack.c.bf16 %v1911_v63, %v1911_v63  ;;  %v1052_v56 = vpack.c.bf16 %v1909_v62, %v1909_v62 }
 0x13e   : > { %v760_v14 = vsel %vm601_vm2, %v744_v10, 0.0  ;;  %v748_v32 = vsel %vm601_vm2, %v740_v22, 0.0 }
 0x13f   : > { %761 = vadd.xlane.f32.xlu0 %v760_v14  ;;  %749 = vadd.xlane.f32.xlu2 %v748_v32 }
 0x143   : > { %v724_v13 = vpop.f32.mrf.mxu3  ;;  %v705_v45 = vpop.f32.mrf.mxu2 }
 0x144   : > { %v1913_v0 = vpop.f32.mrf.mxu1  ;;  %v1915_v1 = vpop.f32.mrf.mxu0  ;;  %v745_v18 = vmul.f32 %v1929_v9, %v724_v13  ;;  %v741_v50 = vmul.f32 %v1935_v17, %v705_v45 }
 0x145   : > { %v1045_v23 = vpack.c.bf16 %v1915_v1, %v1915_v1  ;;  %v1053_v49 = vpack.c.bf16 %v1913_v0, %v1913_v0 }
 0x146   : > { %v763_v31 = vsel %vm601_vm2, %v745_v18, 0.0  ;;  %v751_v55 = vsel %vm601_vm2, %v741_v50, 0.0  ;;  %v1136_v18 = vunpack.c.l.b16 %v1051_v8 }
 0x147   : > { %764 = vadd.xlane.f32.xlu0 %v763_v31  ;;  %v1079_v51 = vunpack.c.l.b16 %v1045_v23  ;;  %752 = vadd.xlane.f32.xlu2 %v751_v55  ;;  %v1138_v13 = vunpack.c.l.b16 %v1053_v49  ;;  %v1478_v23 = vld [vmem:[%s1813_s24] sm:$0xff]  }
 0x14b   : > { %v727_v30 = vpop.f32.mrf.mxu3  ;;  %v708_v16 = vpop.f32.mrf.mxu2 }
 0x14c   : > { %v1917_v2 = vpop.f32.mrf.mxu1  ;;  %v1919_v3 = vpop.f32.mrf.mxu0  ;;  %v746_v36 = vmul.f32 %v1929_v9, %v727_v30 }
 0x14d   : > { %v1046_v33 = vpack.c.bf16 %v1919_v3, %v1919_v3  ;;  %v1054_v42 = vpack.c.bf16 %v1917_v2, %v1917_v2 }
 0x14e   : > { %v766_v41 = vsel %vm601_vm2, %v746_v36, 0.0 }
 0x14f   : > { %767 = vadd.xlane.f32.xlu1 %v766_v41  ;;  %v1080_v52 = vunpack.c.l.b16 %v1046_v33  ;;  %v1139_v57 = vunpack.c.l.b16 %v1054_v42 }
 0x151   : > { %v1086_v14 = vpack.c.b16 %v1080_v52, %v1079_v51 }
 0x153   : > { %v729_v59 = vpop.f32.mrf.mxu3 }
 0x154   : > { %v1921_v4 = vpop.f32.mrf.mxu1  ;;  %v1923_v5 = vpop.f32.mrf.mxu0  ;;  %v747_v10 = vmul.f32 %v1929_v9, %v729_v59  ;;  %v742_v9 = vmul.f32 %v1935_v17, %v708_v16 }
 0x155   : > { %v1047_v19 = vpack.c.bf16 %v1923_v5, %v1923_v5  ;;  %v1055_v34 = vpack.c.bf16 %v1921_v4, %v1921_v4 }
 0x157   : > { %v1081_v35 = vunpack.c.l.b16 %v1047_v19  ;;  %v1140_v53 = vunpack.c.l.b16 %v1055_v34 }
 0x15c   : > { %v670_v6 = vpop.f32.mrf.mxu1  ;;  %v1925_v7 = vpop.f32.mrf.mxu0 }
 0x15d   : > { %v1048_v20 = vpack.c.bf16 %v1925_v7, %v1925_v7  ;;  %v1056_v24 = vpack.c.bf16 %v670_v6, %v670_v6 }
 0x15f   : > { %v1082_v37 = vunpack.c.l.b16 %v1048_v20  ;;  %v1141_v43 = vunpack.c.l.b16 %v1056_v24  ;;  %v754_v20 = vsel %vm601_vm2, %v742_v9, 0.0  ;;  %v1485_v24 = vld [vmem:[%s1813_s24 + $0x8] sm:$0xff]  }
 0x160   : > { %755 = vadd.xlane.f32.xlu0 %v754_v20  ;;  %v1484_v31 = vunpack.c.h.bf16 %v1485_v24 }
 0x161   : > { %v1087_v54 = vpack.c.b16 %v1082_v37, %v1081_v35  ;;  %v1146_v58 = vpack.c.b16 %v1141_v43, %v1140_v53 }
 0x162   : > { %vm2027_vm13 = vcmp.gt.f32.partialorder %v1484_v31, 0.0 }
 0x164   : > { %v673_v11 = vpop.f32.mrf.mxu1  ;;  %v638_v12 = vpop.f32.mrf.mxu0 }
 0x165   : > { %v1049_v15 = vpack.c.bf16 %v638_v12, %v638_v12  ;;  %v1057_v21 = vpack.c.bf16 %v673_v11, %v673_v11 }
 0x167   : > { %v1083_v25 = vunpack.c.l.b16 %v1049_v15  ;;  %v1142_v38 = vunpack.c.l.b16 %v1057_v21  ;;  %v769_v15 = vsel %vm601_vm2, %v747_v10, 0.0 }
 0x168   : > { %770 = vadd.xlane.f32.xlu1 %v769_v15 }
 0x16c   : > { %v675_v26 = vpop.f32.mrf.mxu1  ;;  %v640_v27 = vpop.f32.mrf.mxu0 }
 0x16d   : > { %v1058_v28 = vpack.c.bf16 %v675_v26, %v675_v26  ;;  %1450 = vmatpush.xpose.msk.msrb.mxu1 %vm601_vm2, %v675_v26  ;;  %v1050_v29 = vpack.c.bf16 %v640_v27, %v640_v27  ;;  %1441 = vmatpush.xpose.msk.msrb.mxu0 %vm601_vm2, %v640_v27  ;;  %v1479_v27 = vunpack.c.l.bf16 %v1478_v23 }
 0x16f   : > { %v1143_v39 = vunpack.c.l.b16 %v1058_v28  ;;  %v1084_v40 = vunpack.c.l.b16 %v1050_v29  ;;  %vm2006_vm3 = vcmp.gt.f32.partialorder %v1479_v27, 0.0 }
 0x171   : > { %1451 = vmatpush.xpose.msk.msrb.mxu1 %vm601_vm2, %v673_v11  ;;  %v1147_v44 = vpack.c.b16 %v1143_v39, %v1142_v38  ;;  %1442 = vmatpush.xpose.msk.msrb.mxu0 %vm601_vm2, %v638_v12  ;;  %v1088_v46 = vpack.c.b16 %v1084_v40, %v1083_v25  ;;  %v1077_v11 = vunpack.c.l.b16 %v1043_v47  ;;  %v1078_v12 = vunpack.c.l.b16 %v1044_v48 }
 0x173   : > { %1162 = vmatpush.bf16.msrb.mxu3 %v1147_v44  ;;  %1103 = vmatpush.bf16.msrb.mxu2 %v1088_v46  ;;  %v1085_v19 = vpack.c.b16 %v1078_v12, %v1077_v11 }
 0x175   : > { %1452 = vmatpush.xpose.msk.msrb.mxu1 %vm601_vm2, %v670_v6  ;;  %1443 = vmatpush.xpose.msk.msrb.mxu0 %vm601_vm2, %v1925_v7  ;;  %v1137_v6 = vunpack.c.l.b16 %v1052_v56  ;;  %v1145_v7 = vpack.c.b16 %v1139_v57, %v1138_v13 }
 0x177   : > { %1163 = vmatpush.bf16.msrb.mxu3 %v1146_v58  ;;  %1104 = vmatpush.bf16.msrb.mxu2 %v1087_v54  ;;  %v1144_v21 = vpack.c.b16 %v1137_v6, %v1136_v18 }
 0x179   : > { %1453 = vmatpush.xpose.msk.msrb.mxu1 %vm601_vm2, %v1921_v4  ;;  %1444 = vmatpush.xpose.msk.msrb.mxu0 %vm601_vm2, %v1923_v5  ;;  %v710_v4 = vpop.f32.mrf.mxu2 }
 0x17a   : > { %v743_v5 = vmul.f32 %v1935_v17, %v710_v4 }
 0x17b   : > { %1164 = vmatpush.bf16.msrb.mxu3 %v1145_v7  ;;  %1105 = vmatpush.bf16.msrb.mxu2 %v1086_v14 }
 0x17d   : > { %1454 = vmatpush.xpose.msk.msrb.mxu1 %vm601_vm2, %v1917_v2  ;;  %1445 = vmatpush.xpose.msk.msrb.mxu0 %vm601_vm2, %v1919_v3  ;;  %v757_v2 = vsel %vm601_vm2, %v743_v5, 0.0 }
 0x17e   : > { %758 = vadd.xlane.f32.xlu1 %v757_v2 }
 0x17f   : > { %1165 = vmatpush.bf16.msrb.mxu3 %v1144_v21  ;;  %1106 = vmatpush.bf16.msrb.mxu2 %v1085_v19 }
 0x181   : > { %1455 = vmatpush.xpose.msk.msrb.mxu1 %vm601_vm2, %v1913_v0  ;;  %1446 = vmatpush.xpose.msk.msrb.mxu0 %vm601_vm2, %v1915_v1  ;;  %v773_v0 = vld [vmem:[%s1808_s17 + $0x1] sm:$0x1]  ;;  %v772_v1 = vld [vmem:[%s1808_s17] sm:$0x1] }
 0x185   : > { %1456 = vmatpush.xpose.msk.msrb.mxu1 %vm601_vm2, %v1909_v62  ;;  %1447 = vmatpush.xpose.msk.msrb.mxu0 %vm601_vm2, %v1911_v63 }
 0x189   : > { %1457 = vmatpush.xpose.msk.msrb.mxu1 %vm601_vm2, %v1905_v60  ;;  %1448 = vmatpush.xpose.msk.msrb.mxu0 %vm601_vm2, %v1907_v61  ;;  %v1480_v60 = vunpack.c.h.bf16 %v1478_v23  ;;  %v1483_v61 = vunpack.c.l.bf16 %v1485_v24 }
 0x18b   : > { %vm2010_vm5 = vcmp.gt.f32.partialorder %v1480_v60, 0.0  ;;  %vm2014_vm6 = vcmp.gt.f32.partialorder %v1483_v61, 0.0 }
 0x18c   : > { %1458 = vmatmul.msk.f32.vlgmr.msrb.gmra.mxu1 %vm601_vm2, %v773_v0  ;;  %1449 = vmatmul.msk.f32.vlgmr.msrb.gmra.mxu0 %vm601_vm2, %v772_v1 }
 0x1b2   : > { %v762_v17 = vpop.xlane.xlu0 %761  ;;  %v750_v22 = vpop.xlane.xlu2 %749 }
 0x1ba   : > { %v765_v63 = vpop.xlane.xlu0 %764  ;;  %v753_v30 = vpop.xlane.xlu2 %752 }
 0x1c2   : > { %v768_v3 = vpop.xlane.xlu1 %767 }
 0x1d3   : > { %v756_v49 = vpop.xlane.xlu0 %755 }
 0x1db   : > { %v771_v62 = vpop.xlane.xlu1 %770 }
 0x1f1   : > { %v759_v32 = vpop.xlane.xlu1 %758 }
 0x209   : > { %v865_v25 = vpop.f32.mrf.mxu1  ;;  %v818_v26 = vpop.f32.mrf.mxu0 }
 0x20a   : > { %v869_v28 = vperm.slane %v865_v25, 0  ;;  %v868_v29 = vperm.slane %v818_v26, 0 }
 0x20c   : > { %v875_v33 = vadd.f32 %v869_v28, %v765_v63  ;;  %v876_v34 = vadd.f32 %v869_v28, %v768_v3  ;;  %v877_v35 = vadd.f32 %v869_v28, %v771_v62  ;;  %v874_v36 = vadd.f32 %v869_v28, %v762_v17 }
 0x20d   : > { %v871_v38 = vadd.f32 %v868_v29, %v753_v30  ;;  %v873_v43 = vadd.f32 %v868_v29, %v759_v32  ;;  %v870_v45 = vadd.f32 %v868_v29, %v750_v22  ;;  %v872_v58 = vadd.f32 %v868_v29, %v756_v49 }
 0x20e   : > { %v891_v40 = vmul.f32 0.2, %v875_v33  ;;  %v892_v41 = vmul.f32 0.2, %v876_v34  ;;  %vm882_vm7 = vcmp.gt.f32.partialorder %v874_v36, 0.0  ;;  %vm883_vm8 = vcmp.gt.f32.partialorder %v875_v33, 0.0 }
 0x20f   : > { %v890_v44 = vmul.f32 0.2, %v874_v36  ;;  %v893_v46 = vmul.f32 0.2, %v877_v35  ;;  %v887_v47 = vmul.f32 0.2, %v871_v38 }
 0x210   : > { %v899_v48 = vsel %vm883_vm8, %v875_v33, %v891_v40  ;;  %vm884_vm9 = vcmp.gt.f32.partialorder %v876_v34, 0.0  ;;  %vm885_vm10 = vcmp.gt.f32.partialorder %v877_v35, 0.0  ;;  %vm879_vm11 = vcmp.gt.f32.partialorder %v871_v38, 0.0 }
 0x211   : > { %v898_v50 = vsel %vm882_vm7, %v874_v36, %v890_v44  ;;  %v927_v51 = vsel %vm2010_vm5, %v899_v48, -1e+30  ;;  %v900_v52 = vsel %vm884_vm9, %v876_v34, %v892_v41  ;;  %v895_v59 = vsel %vm879_vm11, %v871_v38, %v887_v47 }
 0x212   : > { %v926_v53 = vsel %vm2006_vm3, %v898_v50, -1e+30  ;;  %v946_v54 = vsel %vm930_vm4, %v927_v51, -inf  ;;  %v928_v55 = vsel %vm2014_vm6, %v900_v52, -1e+30  ;;  %vm878_vm12 = vcmp.gt.f32.partialorder %v870_v45, 0.0 }
 0x213   : > { %v943_v56 = vsel %vm930_vm4, %v926_v53, -inf  ;;  %947 = vmax.xlane.f32.xlu0 %v946_v54  ;;  %v949_v57 = vsel %vm930_vm4, %v928_v55, -inf  ;;  %v886_v8 = vmul.f32 0.2, %v870_v45  ;;  %v901_v10 = vsel %vm885_vm10, %v877_v35, %v893_v46 }
 0x214   : > { %944 = vmax.xlane.f32.xlu2 %v943_v56  ;;  %950 = vmax.xlane.f32.xlu1 %v949_v57  ;;  %v889_v12 = vmul.f32 0.2, %v873_v43  ;;  %v923_v13 = vsel %vm2010_vm5, %v895_v59, -1e+30  ;;  %v888_v15 = vmul.f32 0.2, %v872_v58 }
 0x215   : > { %v894_v14 = vsel %vm878_vm12, %v870_v45, %v886_v8  ;;  %vm881_vm14 = vcmp.gt.f32.partialorder %v873_v43, 0.0  ;;  %v929_v7 = vsel %vm2027_vm13, %v901_v10, -1e+30  ;;  %vm880_vm15 = vcmp.gt.f32.partialorder %v872_v58, 0.0 }
 0x216   : > { %v922_v6 = vsel %vm2006_vm3, %v894_v14, -1e+30  ;;  %v934_v9 = vsel %vm930_vm4, %v923_v13, -inf  ;;  %v897_v18 = vsel %vm881_vm14, %v873_v43, %v889_v12  ;;  %v952_v19 = vsel %vm930_vm4, %v929_v7, -inf }
 0x217   : > { %v931_v16 = vsel %vm930_vm4, %v922_v6, -inf  ;;  %v896_v20 = vsel %vm880_vm15, %v872_v58, %v888_v15  ;;  %v925_v21 = vsel %vm2027_vm13, %v897_v18, -1e+30 }
 0x218   : > { %v924_v4 = vsel %vm2014_vm6, %v896_v20, -1e+30  ;;  %v940_v5 = vsel %vm930_vm4, %v925_v21, -inf }
 0x219   : > { %v937_v2 = vsel %vm930_vm4, %v924_v4, -inf }
 0x21b   : > { %932 = vmax.xlane.f32.xlu0 %v931_v16 }
 0x21c   : > { %953 = vmax.xlane.f32.xlu2 %v952_v19  ;;  %935 = vmax.xlane.f32.xlu1 %v934_v9 }
 0x223   : > { %941 = vmax.xlane.f32.xlu0 %v940_v5 }
 0x224   : > { %938 = vmax.xlane.f32.xlu2 %v937_v2 }
 0x286   : > { %v948_v0 = vpop.xlane.xlu0 %947 }
 0x287   : > { %v945_v1 = vpop.xlane.xlu2 %944  ;;  %v960_v3 = vsub.f32 %v927_v51, %v948_v0  ;;  %v951_v17 = vpop.xlane.xlu1 %950 }
 0x288   : > { %v959_v22 = vsub.f32 %v926_v53, %v945_v1  ;;  %v961_v62 = vsub.f32 %v928_v55, %v951_v17 }
 0x289   : > { %v973_v23 = vmul.f32 1.442695, %v960_v3 }
 0x28a   : > { %v971_v24 = vmul.f32 1.442695, %v959_v22  ;;  %v975_v63 = vmul.f32 1.442695, %v961_v62 }
 0x28b   : > { %1548 = vpow2.f32 %v973_v23 }
 0x28c   : > { %1550 = vpow2.f32 %v971_v24 }
 0x28d   : > { %1552 = vpow2.f32 %v975_v63 }
 0x28e   : > { %v933_v25 = vpop.xlane.xlu0 %932 }
 0x28f   : > { %v954_v26 = vpop.xlane.xlu2 %953  ;;  %v936_v27 = vpop.xlane.xlu1 %935  ;;  %v955_v60 = vsub.f32 %v922_v6, %v933_v25 }
 0x290   : > { %v962_v28 = vsub.f32 %v929_v7, %v954_v26  ;;  %v956_v29 = vsub.f32 %v923_v13, %v936_v27 }
 0x291   : > { %v1549_v30 = vpop.eup %1548  ;;  %v963_v61 = vmul.f32 1.442695, %v955_v60 }
 0x292   : > { %v1551_v31 = vpop.eup %1550  ;;  %v977_v32 = vmul.f32 1.442695, %v962_v28  ;;  %v965_v33 = vmul.f32 1.442695, %v956_v29  ;;  %v984_v34 = vsel %vm2010_vm5, %v1549_v30, 0.0 }
 0x293   : > { %v1553_v35 = vpop.eup %1552  ;;  %1554 = vpow2.f32 %v963_v61  ;;  %v1002_v36 = vsel %vm930_vm4, %v984_v34, 0.0  ;;  %v983_v38 = vsel %vm2006_vm3, %v1551_v31, 0.0 }
 0x294   : > { %1556 = vpow2.f32 %v977_v32  ;;  %1003 = vadd.xlane.f32.xlu2 %v1002_v36  ;;  %v999_v40 = vsel %vm930_vm4, %v983_v38, 0.0  ;;  %v2054_v41 = vsel %vm2014_vm6, %v1553_v35, 0.0 }
 0x295   : > { %1558 = vpow2.f32 %v965_v33  ;;  %1000 = vadd.xlane.f32.xlu1 %v999_v40  ;;  %v1005_v43 = vsel %vm930_vm4, %v2054_v41, 0.0 }
 0x296   : > { %1006 = vadd.xlane.f32.xlu0 %v1005_v43  ;;  %v942_v44 = vpop.xlane.xlu0 %941 }
 0x297   : > { %v939_v45 = vpop.xlane.xlu2 %938  ;;  %v958_v46 = vsub.f32 %v925_v21, %v942_v44 }
 0x298   : > { %v957_v47 = vsub.f32 %v924_v4, %v939_v45 }
 0x299   : > { %v1555_v48 = vpop.eup %1554  ;;  %v969_v49 = vmul.f32 1.442695, %v958_v46 }
 0x29a   : > { %v1557_v50 = vpop.eup %1556  ;;  %v967_v51 = vmul.f32 1.442695, %v957_v47  ;;  %v979_v52 = vsel %vm2006_vm3, %v1555_v48, 0.0 }
 0x29b   : > { %v1559_v53 = vpop.eup %1558  ;;  %1560 = vpow2.f32 %v969_v49  ;;  %v986_v54 = vsel %vm2027_vm13, %v1557_v50, 0.0  ;;  %v987_v55 = vsel %vm930_vm4, %v979_v52, 0.0 }
 0x29c   : > { %1562 = vpow2.f32 %v967_v51  ;;  %v1008_v56 = vsel %vm930_vm4, %v986_v54, 0.0  ;;  %v980_v57 = vsel %vm2010_vm5, %v1559_v53, 0.0  ;;  %988 = vadd.xlane.f32.xlu2 %v987_v55 }
 0x29d   : > { %1009 = vadd.xlane.f32.xlu1 %v1008_v56  ;;  %v990_v58 = vsel %vm930_vm4, %v980_v57, 0.0 }
 0x29e   : > { %991 = vadd.xlane.f32.xlu0 %v990_v58  ;;  %v1178_v58 = vld [vmem:[#allocation2 + $0x8] sm:$0xff] }
 0x2a1   : > { %v1561_v37 = vpop.eup %1560 }
 0x2a2   : > { %v1563_v59 = vpop.eup %1562  ;;  %v982_v8 = vsel %vm2027_vm13, %v1561_v37, 0.0 }
 0x2a3   : > { %v981_v10 = vsel %vm2014_vm6, %v1563_v59, 0.0  ;;  %v996_v12 = vsel %vm930_vm4, %v982_v8, 0.0 }
 0x2a4   : > { %v993_v13 = vsel %vm930_vm4, %v981_v10, 0.0  ;;  %997 = vadd.xlane.f32.xlu2 %v996_v12 }
 0x2a5   : > { %994 = vadd.xlane.f32.xlu1 %v993_v13 }
 0x307   : > { %v1004_v39 = vpop.xlane.xlu2 %1003 }
 0x308   : > { %v1016_v14 = vmax.f32 %v1004_v39, 1e-30  ;;  %v1001_v15 = vpop.xlane.xlu1 %1000 }
 0x309   : > { %v1015_v6 = vmax.f32 %v1001_v15, 1e-30  ;;  %v1007_v7 = vpop.xlane.xlu0 %1006 }
 0x30a   : > { %1564 = vrcp.f32 %v1016_v14  ;;  %v1017_v20 = vmax.f32 %v1007_v7, 1e-30  ;;  %v1180_v14 = vld [vmem:[#allocation2 + $0x18] sm:$0xff] }
 0x30b   : > { %1566 = vrcp.f32 %v1015_v6 }
 0x30f   : > { %v989_v16 = vpop.xlane.xlu2 %988 }
 0x310   : > { %v1565_v9 = vpop.eup %1564  ;;  %v1010_v11 = vpop.xlane.xlu1 %1009  ;;  %v1011_v18 = vmax.f32 %v989_v16, 1e-30 }
 0x311   : > { %v1567_v19 = vpop.eup %1566  ;;  %v1032_v42 = vmul.f32 %v1565_v9, %v984_v34  ;;  %v1018_v21 = vmax.f32 %v1010_v11, 1e-30  ;;  %v992_v4 = vpop.xlane.xlu0 %991 }
 0x312   : > { %v1031_v5 = vmul.f32 %v1567_v19, %v983_v38  ;;  %1568 = vrcp.f32 %v1011_v18  ;;  %v1012_v2 = vmax.f32 %v992_v4, 1e-30 }
 0x313   : > { %v1040_v0 = vpack.c.bf16 %v1032_v42, %v1032_v42  ;;  %1570 = vrcp.f32 %v1018_v21 }
 0x314   : > { %v1039_v1 = vpack.c.bf16 %v1031_v5, %v1031_v5  ;;  %1572 = vrcp.f32 %v1012_v2 }
 0x315   : > { %v1123_v3 = vunpack.c.l.b16 %v1040_v0  ;;  %1574 = vrcp.f32 %v1017_v20 }
 0x316   : > { %v1122_v17 = vunpack.c.l.b16 %v1039_v1 }
 0x317   : > { %v998_v22 = vpop.xlane.xlu2 %997 }
 0x318   : > { %v1569_v62 = vpop.eup %1568  ;;  %v995_v23 = vpop.xlane.xlu1 %994  ;;  %v1014_v24 = vmax.f32 %v998_v22, 1e-30  ;;  %v1126_v63 = vpack.c.b16 %v1123_v3, %v1122_v17 }
 0x319   : > { %v1571_v25 = vpop.eup %1570  ;;  %v1027_v26 = vmul.f32 %v1569_v62, %v979_v52  ;;  %v1013_v27 = vmax.f32 %v995_v23, 1e-30 }
 0x31a   : > { %v1573_v60 = vpop.eup %1572  ;;  %1461 = vmatmul.msk.bf16.vlgmr.msrb.gmra.mxu3 %vm930_vm4, %v1126_v63  ;;  %1576 = vrcp.f32 %v1014_v24  ;;  %v1034_v61 = vmul.f32 %v1571_v25, %v986_v54  ;;  %v1177_v54 = vld [vmem:[#allocation2] sm:$0xff] }
 0x31b   : > { %v1575_v28 = vpop.eup %1574  ;;  %v1035_v29 = vpack.c.bf16 %v1027_v26, %v1027_v26  ;;  %v1028_v30 = vmul.f32 %v1573_v60, %v980_v57  ;;  %1578 = vrcp.f32 %v1013_v27 }
 0x31c   : > { %v1033_v33 = vmul.f32 %v1575_v28, %v2054_v41  ;;  %v1042_v35 = vpack.c.bf16 %v1034_v61, %v1034_v61 }
 0x31d   : > { %v1063_v31 = vunpack.c.l.b16 %v1035_v29  ;;  %v1036_v32 = vpack.c.bf16 %v1028_v30, %v1028_v30 }
 0x31e   : > { %v1041_v43 = vpack.c.bf16 %v1033_v33, %v1033_v33  ;;  %v1125_v44 = vunpack.c.l.b16 %v1042_v35 }
 0x31f   : > { %v1064_v34 = vunpack.c.l.b16 %v1036_v32 }
 0x320   : > { %v1577_v36 = vpop.eup %1576  ;;  %v1124_v47 = vunpack.c.l.b16 %v1041_v43 }
 0x321   : > { %v1067_v38 = vpack.c.b16 %v1064_v34, %v1063_v31  ;;  %v1579_v40 = vpop.eup %1578  ;;  %v1030_v46 = vmul.f32 %v1577_v36, %v982_v8 }
 0x322   : > { %v1029_v45 = vmul.f32 %v1579_v40, %v981_v10  ;;  %v1127_v48 = vpack.c.b16 %v1125_v44, %v1124_v47  ;;  %v1179_v10 = vld [vmem:[#allocation2 + $0x10] sm:$0xff] }
 0x323   : > { %1459 = vmatmul.msk.bf16.vlgmr.msrb.gmra.mxu2 %vm930_vm4, %v1067_v38  ;;  %v1038_v50 = vpack.c.bf16 %v1030_v46, %v1030_v46 }
 0x324   : > { %v1037_v49 = vpack.c.bf16 %v1029_v45, %v1029_v45 }
 0x325   : > { %v1066_v52 = vunpack.c.l.b16 %v1038_v50 }
 0x326   : > { %v1065_v51 = vunpack.c.l.b16 %v1037_v49 }
 0x328   : > { %v1068_v41 = vpack.c.b16 %v1066_v52, %v1065_v51 }
 0x32a   : > { %1462 = vmatmul.msk.bf16.gmra.mxu3 %vm930_vm4, %v1127_v48 }
 0x333   : > { %1460 = vmatmul.msk.bf16.gmra.mxu2 %vm930_vm4, %v1068_v41 }
 0x39d   : > { %v1167_v53 = vpop.f32.mrf.mxu3 }
 0x39e   : > { %1197 = vrot.lane.b32.xlu0 %v1167_v53, %s1674_s29 }
 0x3a5   : > { %v1169_v55 = vpop.f32.mrf.mxu3 }
 0x3a6   : > { %v1108_v56 = vpop.f32.mrf.mxu2  ;;  %1199 = vrot.lane.b32.xlu1 %v1169_v55, %s1674_s29 }
 0x3a7   : > { %v1181_v57 = vadd.f32 %v1177_v54, %v1108_v56 }
 0x3a9   : > { %1185 = vst.msk [vmem:[#allocation2] sm:$0xff] %vm601_vm2, %v1181_v57 }
 0x3ad   : > { %v1172_v37 = vpop.f32.mrf.mxu3 }
 0x3ae   : > { %v1110_v59 = vpop.f32.mrf.mxu2  ;;  %1201 = vrot.lane.b32.xlu2 %v1172_v37, %s1674_s29 }
 0x3af   : > { %v1182_v8 = vadd.f32 %v1178_v58, %v1110_v59 }
 0x3b0   : > { %v1189_v11 = vld [vmem:[#allocation2] sm:$0xff] }
 0x3b1   : > { %1186 = vst.msk [vmem:[#allocation2 + $0x8] sm:$0xff] %vm601_vm2, %v1182_v8 }
 0x3b5   : > { %v1174_v12 = vpop.f32.mrf.mxu3 }
 0x3b6   : > { %v1113_v13 = vpop.f32.mrf.mxu2  ;;  %1203 = vrot.lane.b32.xlu0 %v1174_v12, %s1674_s29 }
 0x3b7   : > { %v1183_v39 = vadd.f32 %v1179_v10, %v1113_v13 }
 0x3b8   : > { %v1190_v20 = vld [vmem:[#allocation2 + $0x8] sm:$0xff] }
 0x3b9   : > { %1187 = vst.msk [vmem:[#allocation2 + $0x10] sm:$0xff] %vm601_vm2, %v1183_v39 }
 0x3be   : > { %v1115_v15 = vpop.f32.mrf.mxu2 }
 0x3bf   : > { %v1184_v6 = vadd.f32 %v1180_v14, %v1115_v15 }
 0x3c0   : > { %v1191_v16 = vld [vmem:[#allocation2 + $0x10] sm:$0xff] }
 0x3c1   : > { %1188 = vst.msk [vmem:[#allocation2 + $0x18] sm:$0xff] %vm601_vm2, %v1184_v6 }
 0x3c8   : > { %v1192_v4 = vld [vmem:[#allocation2 + $0x18] sm:$0xff] }
 0x408   : > { %v1202_v7 = vpop.permute.xlu2 %1201 }
 0x409   : > { %v1211_v9 = vadd.f32 %v1202_v7, %v1191_v16 }
 0x40b   : > { %1216 = vst.msk [vmem:[#allocation2 + $0x10] sm:$0xff] %vm1213_vm0, %v1211_v9 }
 0x410   : > { %v1198_v18 = vpop.permute.xlu0 %1197 }
 0x411   : > { %v1209_v19 = vadd.f32 %v1198_v18, %v1189_v11 }
 0x413   : > { %1214 = vst.msk [vmem:[#allocation2] sm:$0xff] %vm1213_vm0, %v1209_v19 }
 0x418   : > { %v1200_v42 = vpop.permute.xlu1 %1199 }
 0x419   : > { %v1210_v21 = vadd.f32 %v1200_v42, %v1190_v20 }
 0x41b   : > { %1215 = vst.msk [vmem:[#allocation2 + $0x8] sm:$0xff] %vm1213_vm0, %v1210_v21 }
 0x427   : > { %1221 = sbr.rel (%p1463_p1) target bundleno = 1094 (0x446), region = 72 }
 0x428   : > { %v1204_v5 = vpop.permute.xlu0 %1203 }
 0x429   : > { %v1212_v2 = vadd.f32 %v1204_v5, %v1192_v4 }
 0x42b   : > { %1217 = vst.msk [vmem:[#allocation2 + $0x18] sm:$0xff] %vm1213_vm0, %v1212_v2 }
 0x42c   : > { %v1222_v0 = vld [vmem:[#allocation2] sm:$0xff]  ;;  %v1223_v17 = vld [vmem:[#allocation2 + $0x8] sm:$0xff]  ;;  %v1224_v23 = vld [vmem:[#allocation2 + $0x10] sm:$0xff]  ;;  %vm1266_vm2 = vcmask 261120  }
 0x42d   : > { %v1580_v1 = vld [vmem:[%s2135_s8] ss:$0 sm:$0xff] }
 0x42e   : > { %v1581_v3 = vld [vmem:[%s2136_s9] ss:$0 sm:$0xff]  ;;  %v1230_v22 = vmul.f32 %v1580_v1, %v1222_v0  ;;  %v1231_v62 = vmul.f32 %v1580_v1, %v1223_v17  ;;  %v1232_v63 = vmul.f32 %v1580_v1, %v1224_v23 }
 0x430   : > { %v1238_v26 = vadd.f32 %v1581_v3, %v1230_v22  ;;  %v1239_v27 = vadd.f32 %v1581_v3, %v1231_v62  ;;  %v1240_v60 = vadd.f32 %v1581_v3, %v1232_v63 }
 0x432   : > { %v1225_v24 = vld [vmem:[#allocation2 + $0x18] sm:$0xff]  ;;  %v1246_v29 = vmin.f32 %v1238_v26, 0.0  ;;  %v1247_v30 = vmin.f32 %v1239_v27, 0.0  ;;  %v1248_v61 = vmin.f32 %v1240_v60, 0.0  ;;  %vm1242_vm1 = vcmp.gt.f32.partialorder %v1238_v26, 0.0 }
 0x433   : > { %v1233_v25 = vmul.f32 %v1580_v1, %v1225_v24  ;;  %vm1243_vm3 = vcmp.gt.f32.partialorder %v1239_v27, 0.0  ;;  %vm1244_vm4 = vcmp.gt.f32.partialorder %v1240_v60, 0.0 }
 0x434   : > { %v1250_v32 = vmul.f32 1.442695, %v1246_v29  ;;  %v1252_v33 = vmul.f32 1.442695, %v1247_v30  ;;  %v1254_v34 = vmul.f32 1.442695, %v1248_v61 }
 0x435   : > { %v1241_v28 = vadd.f32 %v1581_v3, %v1233_v25 }
 0x436   : > { %1582 = vpow2.f32 %v1250_v32 }
 0x437   : > { %v1249_v31 = vmin.f32 %v1241_v28, 0.0  ;;  %1584 = vpow2.f32 %v1252_v33  ;;  %vm1245_vm5 = vcmp.gt.f32.partialorder %v1241_v28, 0.0 }
 0x438   : > { %1586 = vpow2.f32 %v1254_v34 }
 0x439   : > { %v1256_v35 = vmul.f32 1.442695, %v1249_v31 }
 0x43b   : > { %1588 = vpow2.f32 %v1256_v35 }
 0x43c   : > { %v1583_v36 = vpop.eup %1582 }
 0x43d   : > { %v1585_v38 = vpop.eup %1584  ;;  %v1464_v40 = vadd.f32 -1.0, %v1583_v36 }
 0x43e   : > { %v1587_v43 = vpop.eup %1586  ;;  %v1465_v44 = vadd.f32 -1.0, %v1585_v38 }
 0x43f   : > { %v1262_v46 = vsel %vm1242_vm1, %v1238_v26, %v1464_v40  ;;  %v1466_v47 = vadd.f32 -1.0, %v1587_v43 }
 0x440   : > { %1267 = vst.msk [vmem:[%s2137_s10] sm:$0xff] %vm1266_vm2, %v1262_v46  ;;  %v1263_v48 = vsel %vm1243_vm3, %v1239_v27, %v1465_v44 }
 0x441   : > { %v1589_v45 = vpop.eup %1588  ;;  %1268 = vst.msk [vmem:[%s2137_s10 + $0x8] sm:$0xff] %vm1266_vm2, %v1263_v48  ;;  %v1264_v50 = vsel %vm1244_vm4, %v1240_v60, %v1466_v47 }
 0x442   : > { %v1467_v49 = vadd.f32 -1.0, %v1589_v45  ;;  %1269 = vst.msk [vmem:[%s2137_s10 + $0x10] sm:$0xff] %vm1266_vm2, %v1264_v50 }
 0x444   : > { %v1265_v51 = vsel %vm1245_vm5, %v1241_v28, %v1467_v49 }
 0x445   : > { %1270 = vst.msk [vmem:[%s2137_s10 + $0x18] sm:$0xff] %vm1266_vm2, %v1265_v51 }
 0x446 PF: > { %s23_s18 = sadd.s32 1, %s1670_s18   ;;  %s2156_s16 = sld [smem:[#allocation6_spill]] }
 0x447   : > { %p20_p2 = scmp.ge.s32.totalorder %s23_s18, 5   ;;  %s2157_s17 = sld [smem:[#allocation7_spill]] }
 0x448   : > { %s2158_s13 = smov %s1654_s14  ;;  %s2159_s14 = smov %s1658_s15 }
 0x449   : > { %s2160_s15 = smov %s1779_s25  ;;  %22 = sbr.rel (!%p20_p2) target bundleno = 6 (0x6), region = 120 }
 0x44e   :  { %1293 = vsyncpa [#allocation4], 1 }
 0x44f   :  { %1295 = vsyncpa [#allocation4 + $0x1], 1 }

</bundles_post_ra>
